<compile_context>
chip_gen: v6e
topology: v6e:2x2x1
jax: 0.10.0
libtpu: 0.0.40
codegen_flags: <defaults>
</compile_context>

<pallas_src>
import functools
import math

import jax
import jax.numpy as jnp
from jax.experimental import pallas as pl
from jax.experimental.pallas import tpu as pltpu


# ----------------------------------------------------------------------------
# Single fused kernel: one grid step = one batch element's full forward pass.
# ----------------------------------------------------------------------------
def _fused_forward_kernel(num_layers, n_heads, eps, mxu_dtype,
                          board_ref, w_in_ref, b_in_ref,
                          wqkv_ref, bqkv_ref, wo_ref, bo_ref,
                          g1_ref, be1_ref, w1_ref, bf1_ref,
                          w2_ref, bf2_ref, g2_ref, be2_ref,
                          w_head_ref, b_head_ref, out_ref):
    H = n_heads

    def mm(a, b):
        return jnp.dot(a.astype(mxu_dtype), b.astype(mxu_dtype),
                       preferred_element_type=jnp.float32)

    def layernorm(h, gamma, beta):
        mu = jnp.mean(h, axis=-1, keepdims=True)
        var = jnp.mean((h - mu) * (h - mu), axis=-1, keepdims=True)
        return (h - mu) * jax.lax.rsqrt(var + eps) * gamma + beta

    x = board_ref[0]                                    # (S, In) this batch
    S = x.shape[0]
    D = w_in_ref.shape[1]

    # ---- input projection ---------------------------------------------------
    x = mm(x, w_in_ref[...]) + b_in_ref[...]            # (S, D), f32

    # ---- encoder layers (static unroll; weights indexed on leading L axis) --
    for l in range(num_layers):
        # -- multi-head self-attention, batched over the head axis --
        wqkv = wqkv_ref[l].astype(mxu_dtype)             # (H, D, 3*Dh)
        Dh = wqkv.shape[-1] // 3

        # Fused per-head QKV projection (head-batched matmul on the MXU).
        # The 1/sqrt(Dh) attention scale is already folded into the Q slice.
        xb = jnp.broadcast_to(x.astype(mxu_dtype), (H, S, D))
        qkv = jnp.einsum('hsd,hde->hse', xb, wqkv,
                         preferred_element_type=jnp.float32) + bqkv_ref[l]
        q = qkv[:, :, 0:Dh]                              # (H, S, Dh)
        k = qkv[:, :, Dh:2 * Dh]                         # (H, S, Dh)
        v = qkv[:, :, 2 * Dh:3 * Dh]                     # (H, S, Dh)

        s = jnp.einsum('hqe,hke->hqk',
                       q.astype(mxu_dtype), k.astype(mxu_dtype),
                       preferred_element_type=jnp.float32)        # (H, S, S)
        m = jnp.max(s, axis=-1, keepdims=True)
        e = jnp.exp(s - m)
        p = e * pl.reciprocal(jnp.sum(e, axis=-1, keepdims=True), approx=True)

        ctx = jnp.einsum('hqk,hke->hqe',
                         p.astype(mxu_dtype), v.astype(mxu_dtype),
                         preferred_element_type=jnp.float32)      # (H, S, Dh)
        # Per-head slice of W_O, then sum over heads (no concat / relayout).
        attn = jnp.einsum('hse,hed->hsd',
                          ctx.astype(mxu_dtype), wo_ref[l].astype(mxu_dtype),
                          preferred_element_type=jnp.float32)     # (H, S, D)
        attn = jnp.sum(attn, axis=0) + bo_ref[l]                  # (S, D)

        # -- residual + LayerNorm1 (post-norm) --
        x = layernorm(x + attn, g1_ref[l], be1_ref[l])

        # -- feed-forward (ReLU); dropout = identity (eval mode) --
        ff = mm(x, w1_ref[l]) + bf1_ref[l]
        ff = jnp.maximum(ff, 0.0)
        ff = mm(ff, w2_ref[l]) + bf2_ref[l]

        # -- residual + LayerNorm2 --
        x = layernorm(x + ff, g2_ref[l], be2_ref[l])

    # ---- mean-pool over sequence + fused output heads ------------------------
    pooled = jnp.mean(x, axis=0, keepdims=True)                   # (1, D)
    out_ref[0] = mm(pooled, w_head_ref[...]) + b_head_ref[...]    # (1, bin+1)


def chess_transformer_forward(params, board, n_heads, num_layers,
                              eps=1e-5, mxu_dtype=jnp.float32):
    """Returns (win_prob_logits [B, bin_dim], mateness_logit [B, 1])."""
    B, S, In = board.shape
    D = params["w_in"].shape[1]
    F = params["w1"].shape[2]
    L = num_layers
    H = n_heads
    Dh = D // H
    Hout = params["w_head"].shape[1]                     # bin_dim + 1

    def wspec(shape):
        # Full-array block, constant index_map -> weight fetched once per core
        # and kept resident in VMEM across all grid steps.
        return pl.BlockSpec(shape, lambda b, n=len(shape): (0,) * n)

    weight_items = [
        ("w_in", (In, D)), ("b_in", (1, D)),
        ("wqkv", (L, H, D, 3 * Dh)), ("bqkv", (L, H, 1, 3 * Dh)),
        ("wo", (L, H, Dh, D)), ("bo", (L, 1, D)),
        ("g1", (L, 1, D)), ("be1", (L, 1, D)),
        ("w1", (L, D, F)), ("bf1", (L, 1, F)),
        ("w2", (L, F, D)), ("bf2", (L, 1, D)),
        ("g2", (L, 1, D)), ("be2", (L, 1, D)),
        ("w_head", (D, Hout)), ("b_head", (1, Hout)),
    ]

    in_specs = [pl.BlockSpec((1, S, In), lambda b: (b, 0, 0))]
    args = [board]
    for name, shape in weight_items:
        in_specs.append(wspec(shape))
        args.append(params[name])

    kernel = functools.partial(_fused_forward_kernel, L, H, eps, mxu_dtype)
    out = pl.pallas_call(
        kernel,
        out_shape=jax.ShapeDtypeStruct((B, 1, Hout), jnp.float32),
        grid=(B,),
        in_specs=in_specs,
        out_specs=pl.BlockSpec((1, 1, Hout), lambda b: (b, 0, 0)),
        compiler_params=pltpu.CompilerParams(
            dimension_semantics=("parallel",)),
    )(*args)

    out = out.reshape(B, Hout)
    bin_dim = Hout - 1
    return out[:, :bin_dim], out[:, bin_dim:]


# ----------------------------------------------------------------------------
# Deterministic parameter init (shapes mirror the torch module), pre-packed
# into the head-major / pre-transposed layout the kernel expects.
# ----------------------------------------------------------------------------
def init_params(key, input_dim, model_dim, bin_dim, n_heads, num_layers, dim_ff):
    D, H, F, L = model_dim, n_heads, dim_ff, num_layers
    Dh = D // H
    scale = 1.0 / math.sqrt(Dh)

    def linear_init(k, fan_in, fan_out):
        k1, k2 = jax.random.split(k)
        bound = 1.0 / math.sqrt(fan_in)
        w = jax.random.uniform(k1, (fan_out, fan_in), jnp.float32, -bound, bound)
        b = jax.random.uniform(k2, (fan_out,), jnp.float32, -bound, bound)
        return w, b

    keys = jax.random.split(key, 3 + L)
    params = {}

    w, b = linear_init(keys[0], input_dim, D)
    params["w_in"] = w.T                                      # (In, D)
    params["b_in"] = b.reshape(1, D)

    wb, bb = linear_init(keys[1], D, bin_dim)
    wm, bm = linear_init(keys[2], D, 1)
    params["w_head"] = jnp.concatenate([wb.T, wm.T], axis=1)  # (D, bin_dim+1)
    params["b_head"] = jnp.concatenate([bb, bm]).reshape(1, bin_dim + 1)

    wqkv_l, bqkv_l, wo_l, bo_l = [], [], [], []
    g1l, be1l, w1l, bf1l, w2l, bf2l, g2l, be2l = ([] for _ in range(8))
    for l in range(L):
        lk = jax.random.split(keys[3 + l], 6)
        bound = 1.0 / math.sqrt(D)
        in_w = jax.random.uniform(lk[0], (3 * D, D), jnp.float32, -bound, bound)
        in_b = jax.random.uniform(lk[1], (3 * D,), jnp.float32, -bound, bound)
        wq, wk, wv = in_w[:D], in_w[D:2 * D], in_w[2 * D:]
        bq, bk, bv = in_b[:D], in_b[D:2 * D], in_b[2 * D:]

        # Head-major fused QKV weights; attention scale folded into the Q part.
        wqkv_h = jnp.stack([
            jnp.concatenate([wq[h * Dh:(h + 1) * Dh].T * scale,
                             wk[h * Dh:(h + 1) * Dh].T,
                             wv[h * Dh:(h + 1) * Dh].T], axis=1)     # (D, 3*Dh)
            for h in range(H)], axis=0)                               # (H, D, 3*Dh)
        bqkv_h = jnp.stack([
            jnp.concatenate([bq[h * Dh:(h + 1) * Dh] * scale,
                             bk[h * Dh:(h + 1) * Dh],
                             bv[h * Dh:(h + 1) * Dh]]).reshape(1, 3 * Dh)
            for h in range(H)], axis=0)                               # (H, 1, 3*Dh)

        wo, bo = linear_init(lk[2], D, D)
        wo_t = wo.T                                                   # (D, D)
        wo_h = jnp.stack([wo_t[h * Dh:(h + 1) * Dh, :]
                          for h in range(H)], axis=0)                 # (H, Dh, D)

        w1, bf1 = linear_init(lk[3], D, F)
        w2, bf2 = linear_init(lk[4], F, D)

        wqkv_l.append(wqkv_h); bqkv_l.append(bqkv_h)
        wo_l.append(wo_h); bo_l.append(bo.reshape(1, D))
        g1l.append(jnp.ones((1, D), jnp.float32))
        be1l.append(jnp.zeros((1, D), jnp.float32))
        w1l.append(w1.T); bf1l.append(bf1.reshape(1, F))
        w2l.append(w2.T); bf2l.append(bf2.reshape(1, D))
        g2l.append(jnp.ones((1, D), jnp.float32))
        be2l.append(jnp.zeros((1, D), jnp.float32))

    params["wqkv"] = jnp.stack(wqkv_l)       # (L, H, D, 3*Dh)
    params["bqkv"] = jnp.stack(bqkv_l)       # (L, H, 1, 3*Dh)
    params["wo"] = jnp.stack(wo_l)           # (L, H, Dh, D)
    params["bo"] = jnp.stack(bo_l)           # (L, 1, D)
    params["g1"] = jnp.stack(g1l)
    params["be1"] = jnp.stack(be1l)
    params["w1"] = jnp.stack(w1l)            # (L, D, F)
    params["bf1"] = jnp.stack(bf1l)          # (L, 1, F)
    params["w2"] = jnp.stack(w2l)            # (L, F, D)
    params["bf2"] = jnp.stack(bf2l)
    params["g2"] = jnp.stack(g2l)
    params["be2"] = jnp.stack(be2l)
    return params


if __name__ == "__main__":
    # Small config consistent with the module's forward.
    B, S = 2, 8
    input_dim, model_dim, bin_dim = 24, 32, 16
    n_heads, num_layers, dim_ff = 4, 2, 64

    key = jax.random.PRNGKey(0)
    pkey, xkey = jax.random.split(key)
    params = init_params(pkey, input_dim, model_dim, bin_dim,
                         n_heads, num_layers, dim_ff)
    board = jax.random.normal(xkey, (B, S, input_dim), jnp.float32)

    # mxu_dtype=jnp.bfloat16 may be passed on v6e/v7x to use the bf16 MXU path;
    # default f32 keeps numerics identical to the PyTorch module.
    win_prob_logits, mateness_logit = chess_transformer_forward(
        params, board, n_heads, num_layers)
    jax.block_until_ready((win_prob_logits, mateness_logit))

    assert win_prob_logits.shape == (B, bin_dim)
    assert mateness_logit.shape == (B, 1)
    assert bool(jnp.all(jnp.isfinite(win_prob_logits)))
    assert bool(jnp.all(jnp.isfinite(mateness_logit)))
    print("KERNEL_OK")
</pallas_src>

<mosaic_0001>
module attributes {stable_mosaic.version = 11 : i64} {
  func.func @_fused_forward_kernel(%arg0: i32, %arg1: memref<1x8x24xf32, #tpu.memory_space<vmem>>, %arg2: memref<24x32xf32, #tpu.memory_space<vmem>>, %arg3: memref<1x32xf32, #tpu.memory_space<vmem>>, %arg4: memref<2x4x32x24xf32, #tpu.memory_space<vmem>>, %arg5: memref<2x4x1x24xf32, #tpu.memory_space<vmem>>, %arg6: memref<2x4x8x32xf32, #tpu.memory_space<vmem>>, %arg7: memref<2x1x32xf32, #tpu.memory_space<vmem>>, %arg8: memref<2x1x32xf32, #tpu.memory_space<vmem>>, %arg9: memref<2x1x32xf32, #tpu.memory_space<vmem>>, %arg10: memref<2x32x64xf32, #tpu.memory_space<vmem>>, %arg11: memref<2x1x64xf32, #tpu.memory_space<vmem>>, %arg12: memref<2x64x32xf32, #tpu.memory_space<vmem>>, %arg13: memref<2x1x32xf32, #tpu.memory_space<vmem>>, %arg14: memref<2x1x32xf32, #tpu.memory_space<vmem>>, %arg15: memref<2x1x32xf32, #tpu.memory_space<vmem>>, %arg16: memref<32x17xf32, #tpu.memory_space<vmem>>, %arg17: memref<1x17xf32, #tpu.memory_space<vmem>>, %arg18: memref<1x1x17xf32, #tpu.memory_space<vmem>>) attributes {dimension_semantics = [#tpu.dimension_semantics<parallel>], iteration_bounds = array<i64: 2>, scalar_prefetch = 0 : i64, scratch_operands = 0 : i64, tpu.core_type = #tpu.core_type<tc>, window_params = [{transform_indices = @transform_0, window_bounds = array<i64: 1, 8, 24>}, {pipeline_mode = #tpu.pipeline_mode<synchronous>, transform_indices = @transform_1, window_bounds = array<i64: 24, 32>}, {pipeline_mode = #tpu.pipeline_mode<synchronous>, transform_indices = @transform_2, window_bounds = array<i64: 1, 32>}, {pipeline_mode = #tpu.pipeline_mode<synchronous>, transform_indices = @transform_3, window_bounds = array<i64: 2, 4, 32, 24>}, {pipeline_mode = #tpu.pipeline_mode<synchronous>, transform_indices = @transform_4, window_bounds = array<i64: 2, 4, 1, 24>}, {pipeline_mode = #tpu.pipeline_mode<synchronous>, transform_indices = @transform_5, window_bounds = array<i64: 2, 4, 8, 32>}, {pipeline_mode = #tpu.pipeline_mode<synchronous>, transform_indices = @transform_6, window_bounds = array<i64: 2, 1, 32>}, {pipeline_mode = #tpu.pipeline_mode<synchronous>, transform_indices = @transform_7, window_bounds = array<i64: 2, 1, 32>}, {pipeline_mode = #tpu.pipeline_mode<synchronous>, transform_indices = @transform_8, window_bounds = array<i64: 2, 1, 32>}, {pipeline_mode = #tpu.pipeline_mode<synchronous>, transform_indices = @transform_9, window_bounds = array<i64: 2, 32, 64>}, {pipeline_mode = #tpu.pipeline_mode<synchronous>, transform_indices = @transform_10, window_bounds = array<i64: 2, 1, 64>}, {pipeline_mode = #tpu.pipeline_mode<synchronous>, transform_indices = @transform_11, window_bounds = array<i64: 2, 64, 32>}, {pipeline_mode = #tpu.pipeline_mode<synchronous>, transform_indices = @transform_12, window_bounds = array<i64: 2, 1, 32>}, {pipeline_mode = #tpu.pipeline_mode<synchronous>, transform_indices = @transform_13, window_bounds = array<i64: 2, 1, 32>}, {pipeline_mode = #tpu.pipeline_mode<synchronous>, transform_indices = @transform_14, window_bounds = array<i64: 2, 1, 32>}, {pipeline_mode = #tpu.pipeline_mode<synchronous>, transform_indices = @transform_15, window_bounds = array<i64: 32, 17>}, {pipeline_mode = #tpu.pipeline_mode<synchronous>, transform_indices = @transform_16, window_bounds = array<i64: 1, 17>}, {transform_indices = @transform_17, window_bounds = array<i64: 1, 1, 17>}]} {
    %c0 = arith.constant 0 : index
    %c0_0 = arith.constant 0 : index
    %c0_1 = arith.constant 0 : index
    %0 = vector.load %arg1[%c0, %c0_0, %c0_1] : memref<1x8x24xf32, #tpu.memory_space<vmem>>, vector<1x8x24xf32>
    %1 = vector.shape_cast %0 : vector<1x8x24xf32> to vector<8x24xf32>
    %c0_2 = arith.constant 0 : index
    %c0_3 = arith.constant 0 : index
    %2 = vector.load %arg2[%c0_2, %c0_3] : memref<24x32xf32, #tpu.memory_space<vmem>>, vector<24x32xf32>
    %cst = arith.constant dense<0.000000e+00> : vector<8x32xf32>
    %3 = tpu.matmul %1, %2, %cst {dimension_numbers = #tpu.dot_dimension_numbers<[1], [0], [0], [1], [0, 0, 1, 1], [], []>} : vector<8x24xf32>, vector<24x32xf32>, vector<8x32xf32> -> vector<8x32xf32>
    %c0_4 = arith.constant 0 : index
    %c0_5 = arith.constant 0 : index
    %4 = vector.load %arg3[%c0_4, %c0_5] : memref<1x32xf32, #tpu.memory_space<vmem>>, vector<1x32xf32>
    %5 = vector.broadcast %4 : vector<1x32xf32> to vector<8x32xf32>
    %6 = arith.addf %3, %5 : vector<8x32xf32>
    %c0_6 = arith.constant 0 : index
    %c0_7 = arith.constant 0 : index
    %c0_8 = arith.constant 0 : index
    %c0_9 = arith.constant 0 : index
    %7 = vector.load %arg4[%c0_6, %c0_7, %c0_8, %c0_9] : memref<2x4x32x24xf32, #tpu.memory_space<vmem>>, vector<1x4x32x24xf32>
    %8 = vector.shape_cast %7 : vector<1x4x32x24xf32> to vector<4x32x24xf32>
    %9 = vector.shape_cast %6 : vector<8x32xf32> to vector<1x8x32xf32>
    %10 = vector.broadcast %9 : vector<1x8x32xf32> to vector<4x8x32xf32>
    "tpu.trace_start"() <{level = 10 : i32, message = "hsd,hde->hse"}> : () -> ()
    %cst_10 = arith.constant dense<0.000000e+00> : vector<4x8x24xf32>
    %11 = tpu.matmul %10, %8, %cst_10 {dimension_numbers = #tpu.dot_dimension_numbers<[2], [1], [1], [2], [0, 0, 0, 1, 1, 2], [0], [0]>} : vector<4x8x32xf32>, vector<4x32x24xf32>, vector<4x8x24xf32> -> vector<4x8x24xf32>
    "tpu.trace_stop"() : () -> ()
    %c0_11 = arith.constant 0 : index
    %c0_12 = arith.constant 0 : index
    %c0_13 = arith.constant 0 : index
    %c0_14 = arith.constant 0 : index
    %12 = vector.load %arg5[%c0_11, %c0_12, %c0_13, %c0_14] : memref<2x4x1x24xf32, #tpu.memory_space<vmem>>, vector<1x4x1x24xf32>
    %13 = vector.shape_cast %12 : vector<1x4x1x24xf32> to vector<4x1x24xf32>
    %14 = vector.broadcast %13 : vector<4x1x24xf32> to vector<4x8x24xf32>
    %15 = arith.addf %11, %14 : vector<4x8x24xf32>
    %16 = vector.extract_strided_slice %15 {offsets = [0, 0, 0], sizes = [4, 8, 8], strides = [1, 1, 1]} : vector<4x8x24xf32> to vector<4x8x8xf32>
    %17 = vector.extract_strided_slice %15 {offsets = [0, 0, 8], sizes = [4, 8, 8], strides = [1, 1, 1]} : vector<4x8x24xf32> to vector<4x8x8xf32>
    %18 = vector.extract_strided_slice %15 {offsets = [0, 0, 16], sizes = [4, 8, 8], strides = [1, 1, 1]} : vector<4x8x24xf32> to vector<4x8x8xf32>
    "tpu.trace_start"() <{level = 10 : i32, message = "hqe,hke->hqk"}> : () -> ()
    %cst_15 = arith.constant dense<0.000000e+00> : vector<4x8x8xf32>
    %19 = tpu.matmul %16, %17, %cst_15 {dimension_numbers = #tpu.dot_dimension_numbers<[2], [2], [1], [1], [0, 0, 0, 1, 1, 1], [0], [0]>} : vector<4x8x8xf32>, vector<4x8x8xf32>, vector<4x8x8xf32> -> vector<4x8x8xf32>
    "tpu.trace_stop"() : () -> ()
    %cst_16 = arith.constant dense<0xFF800000> : vector<4x8xf32>
    %20 = vector.multi_reduction <maximumf>, %19, %cst_16 [2] : vector<4x8x8xf32> to vector<4x8xf32>
    %21 = vector.shape_cast %20 : vector<4x8xf32> to vector<4x8x1xf32>
    %22 = vector.broadcast %21 : vector<4x8x1xf32> to vector<4x8x8xf32>
    %23 = arith.subf %19, %22 : vector<4x8x8xf32>
    %24 = math.exp %23 : vector<4x8x8xf32>
    %cst_17 = arith.constant dense<0.000000e+00> : vector<4x8xf32>
    %25 = vector.multi_reduction <add>, %24, %cst_17 [2] : vector<4x8x8xf32> to vector<4x8xf32>
    %26 = vector.shape_cast %25 : vector<4x8xf32> to vector<4x8x1xf32>
    %27 = tpu.reciprocal %26 {approx = true} : vector<4x8x1xf32> -> vector<4x8x1xf32>
    %28 = vector.broadcast %27 : vector<4x8x1xf32> to vector<4x8x8xf32>
    %29 = arith.mulf %24, %28 : vector<4x8x8xf32>
    "tpu.trace_start"() <{level = 10 : i32, message = "hqk,hke->hqe"}> : () -> ()
    %cst_18 = arith.constant dense<0.000000e+00> : vector<4x8x8xf32>
    %30 = tpu.matmul %29, %18, %cst_18 {dimension_numbers = #tpu.dot_dimension_numbers<[2], [1], [1], [2], [0, 0, 0, 1, 1, 2], [0], [0]>} : vector<4x8x8xf32>, vector<4x8x8xf32>, vector<4x8x8xf32> -> vector<4x8x8xf32>
    "tpu.trace_stop"() : () -> ()
    %c0_19 = arith.constant 0 : index
    %c0_20 = arith.constant 0 : index
    %c0_21 = arith.constant 0 : index
    %c0_22 = arith.constant 0 : index
    %31 = vector.load %arg6[%c0_19, %c0_20, %c0_21, %c0_22] : memref<2x4x8x32xf32, #tpu.memory_space<vmem>>, vector<1x4x8x32xf32>
    %32 = vector.shape_cast %31 : vector<1x4x8x32xf32> to vector<4x8x32xf32>
    "tpu.trace_start"() <{level = 10 : i32, message = "hse,hed->hsd"}> : () -> ()
    %cst_23 = arith.constant dense<0.000000e+00> : vector<4x8x32xf32>
    %33 = tpu.matmul %30, %32, %cst_23 {dimension_numbers = #tpu.dot_dimension_numbers<[2], [1], [1], [2], [0, 0, 0, 1, 1, 2], [0], [0]>} : vector<4x8x8xf32>, vector<4x8x32xf32>, vector<4x8x32xf32> -> vector<4x8x32xf32>
    "tpu.trace_stop"() : () -> ()
    %cst_24 = arith.constant dense<0.000000e+00> : vector<8x32xf32>
    %34 = vector.multi_reduction <add>, %33, %cst_24 [0] : vector<4x8x32xf32> to vector<8x32xf32>
    %c0_25 = arith.constant 0 : index
    %c0_26 = arith.constant 0 : index
    %c0_27 = arith.constant 0 : index
    %35 = vector.load %arg7[%c0_25, %c0_26, %c0_27] : memref<2x1x32xf32, #tpu.memory_space<vmem>>, vector<1x1x32xf32>
    %36 = vector.shape_cast %35 : vector<1x1x32xf32> to vector<1x32xf32>
    %37 = vector.broadcast %36 : vector<1x32xf32> to vector<8x32xf32>
    %38 = arith.addf %34, %37 : vector<8x32xf32>
    %39 = arith.addf %6, %38 : vector<8x32xf32>
    %c0_28 = arith.constant 0 : index
    %c0_29 = arith.constant 0 : index
    %c0_30 = arith.constant 0 : index
    %40 = vector.load %arg8[%c0_28, %c0_29, %c0_30] : memref<2x1x32xf32, #tpu.memory_space<vmem>>, vector<1x1x32xf32>
    %41 = vector.shape_cast %40 : vector<1x1x32xf32> to vector<1x32xf32>
    %c0_31 = arith.constant 0 : index
    %c0_32 = arith.constant 0 : index
    %c0_33 = arith.constant 0 : index
    %42 = vector.load %arg9[%c0_31, %c0_32, %c0_33] : memref<2x1x32xf32, #tpu.memory_space<vmem>>, vector<1x1x32xf32>
    %43 = vector.shape_cast %42 : vector<1x1x32xf32> to vector<1x32xf32>
    %cst_34 = arith.constant dense<0.000000e+00> : vector<8xf32>
    %44 = vector.multi_reduction <add>, %39, %cst_34 [1] : vector<8x32xf32> to vector<8xf32>
    %45 = vector.shape_cast %44 : vector<8xf32> to vector<8x1xf32>
    %cst_35 = arith.constant 3.200000e+01 : f32
    %46 = vector.broadcast %cst_35 : f32 to vector<8x1xf32>
    %47 = arith.divf %45, %46 : vector<8x1xf32>
    %48 = vector.broadcast %47 : vector<8x1xf32> to vector<8x32xf32>
    %49 = arith.subf %39, %48 : vector<8x32xf32>
    %50 = vector.broadcast %47 : vector<8x1xf32> to vector<8x32xf32>
    %51 = arith.subf %39, %50 : vector<8x32xf32>
    %52 = arith.mulf %49, %51 : vector<8x32xf32>
    %cst_36 = arith.constant dense<0.000000e+00> : vector<8xf32>
    %53 = vector.multi_reduction <add>, %52, %cst_36 [1] : vector<8x32xf32> to vector<8xf32>
    %54 = vector.shape_cast %53 : vector<8xf32> to vector<8x1xf32>
    %cst_37 = arith.constant 3.200000e+01 : f32
    %55 = vector.broadcast %cst_37 : f32 to vector<8x1xf32>
    %56 = arith.divf %54, %55 : vector<8x1xf32>
    %57 = vector.broadcast %47 : vector<8x1xf32> to vector<8x32xf32>
    %58 = arith.subf %39, %57 : vector<8x32xf32>
    %cst_38 = arith.constant 9.99999974E-6 : f32
    %59 = vector.broadcast %cst_38 : f32 to vector<8x1xf32>
    %60 = arith.addf %56, %59 : vector<8x1xf32>
    %61 = math.rsqrt %60 : vector<8x1xf32>
    %62 = vector.broadcast %61 : vector<8x1xf32> to vector<8x32xf32>
    %63 = arith.mulf %58, %62 : vector<8x32xf32>
    %64 = vector.broadcast %41 : vector<1x32xf32> to vector<8x32xf32>
    %65 = arith.mulf %63, %64 : vector<8x32xf32>
    %66 = vector.broadcast %43 : vector<1x32xf32> to vector<8x32xf32>
    %67 = arith.addf %65, %66 : vector<8x32xf32>
    %c0_39 = arith.constant 0 : index
    %c0_40 = arith.constant 0 : index
    %c0_41 = arith.constant 0 : index
    %68 = vector.load %arg10[%c0_39, %c0_40, %c0_41] : memref<2x32x64xf32, #tpu.memory_space<vmem>>, vector<1x32x64xf32>
    %69 = vector.shape_cast %68 : vector<1x32x64xf32> to vector<32x64xf32>
    %cst_42 = arith.constant dense<0.000000e+00> : vector<8x64xf32>
    %70 = tpu.matmul %67, %69, %cst_42 {dimension_numbers = #tpu.dot_dimension_numbers<[1], [0], [0], [1], [0, 0, 1, 1], [], []>} : vector<8x32xf32>, vector<32x64xf32>, vector<8x64xf32> -> vector<8x64xf32>
    %c0_43 = arith.constant 0 : index
    %c0_44 = arith.constant 0 : index
    %c0_45 = arith.constant 0 : index
    %71 = vector.load %arg11[%c0_43, %c0_44, %c0_45] : memref<2x1x64xf32, #tpu.memory_space<vmem>>, vector<1x1x64xf32>
    %72 = vector.shape_cast %71 : vector<1x1x64xf32> to vector<1x64xf32>
    %73 = vector.broadcast %72 : vector<1x64xf32> to vector<8x64xf32>
    %74 = arith.addf %70, %73 : vector<8x64xf32>
    %cst_46 = arith.constant 0.000000e+00 : f32
    %75 = vector.broadcast %cst_46 : f32 to vector<8x64xf32>
    %76 = arith.maximumf %74, %75 : vector<8x64xf32>
    %c0_47 = arith.constant 0 : index
    %c0_48 = arith.constant 0 : index
    %c0_49 = arith.constant 0 : index
    %77 = vector.load %arg12[%c0_47, %c0_48, %c0_49] : memref<2x64x32xf32, #tpu.memory_space<vmem>>, vector<1x64x32xf32>
    %78 = vector.shape_cast %77 : vector<1x64x32xf32> to vector<64x32xf32>
    %cst_50 = arith.constant dense<0.000000e+00> : vector<8x32xf32>
    %79 = tpu.matmul %76, %78, %cst_50 {dimension_numbers = #tpu.dot_dimension_numbers<[1], [0], [0], [1], [0, 0, 1, 1], [], []>} : vector<8x64xf32>, vector<64x32xf32>, vector<8x32xf32> -> vector<8x32xf32>
    %c0_51 = arith.constant 0 : index
    %c0_52 = arith.constant 0 : index
    %c0_53 = arith.constant 0 : index
    %80 = vector.load %arg13[%c0_51, %c0_52, %c0_53] : memref<2x1x32xf32, #tpu.memory_space<vmem>>, vector<1x1x32xf32>
    %81 = vector.shape_cast %80 : vector<1x1x32xf32> to vector<1x32xf32>
    %82 = vector.broadcast %81 : vector<1x32xf32> to vector<8x32xf32>
    %83 = arith.addf %79, %82 : vector<8x32xf32>
    %84 = arith.addf %67, %83 : vector<8x32xf32>
    %c0_54 = arith.constant 0 : index
    %c0_55 = arith.constant 0 : index
    %c0_56 = arith.constant 0 : index
    %85 = vector.load %arg14[%c0_54, %c0_55, %c0_56] : memref<2x1x32xf32, #tpu.memory_space<vmem>>, vector<1x1x32xf32>
    %86 = vector.shape_cast %85 : vector<1x1x32xf32> to vector<1x32xf32>
    %c0_57 = arith.constant 0 : index
    %c0_58 = arith.constant 0 : index
    %c0_59 = arith.constant 0 : index
    %87 = vector.load %arg15[%c0_57, %c0_58, %c0_59] : memref<2x1x32xf32, #tpu.memory_space<vmem>>, vector<1x1x32xf32>
    %88 = vector.shape_cast %87 : vector<1x1x32xf32> to vector<1x32xf32>
    %cst_60 = arith.constant dense<0.000000e+00> : vector<8xf32>
    %89 = vector.multi_reduction <add>, %84, %cst_60 [1] : vector<8x32xf32> to vector<8xf32>
    %90 = vector.shape_cast %89 : vector<8xf32> to vector<8x1xf32>
    %cst_61 = arith.constant 3.200000e+01 : f32
    %91 = vector.broadcast %cst_61 : f32 to vector<8x1xf32>
    %92 = arith.divf %90, %91 : vector<8x1xf32>
    %93 = vector.broadcast %92 : vector<8x1xf32> to vector<8x32xf32>
    %94 = arith.subf %84, %93 : vector<8x32xf32>
    %95 = vector.broadcast %92 : vector<8x1xf32> to vector<8x32xf32>
    %96 = arith.subf %84, %95 : vector<8x32xf32>
    %97 = arith.mulf %94, %96 : vector<8x32xf32>
    %cst_62 = arith.constant dense<0.000000e+00> : vector<8xf32>
    %98 = vector.multi_reduction <add>, %97, %cst_62 [1] : vector<8x32xf32> to vector<8xf32>
    %99 = vector.shape_cast %98 : vector<8xf32> to vector<8x1xf32>
    %cst_63 = arith.constant 3.200000e+01 : f32
    %100 = vector.broadcast %cst_63 : f32 to vector<8x1xf32>
    %101 = arith.divf %99, %100 : vector<8x1xf32>
    %102 = vector.broadcast %92 : vector<8x1xf32> to vector<8x32xf32>
    %103 = arith.subf %84, %102 : vector<8x32xf32>
    %cst_64 = arith.constant 9.99999974E-6 : f32
    %104 = vector.broadcast %cst_64 : f32 to vector<8x1xf32>
    %105 = arith.addf %101, %104 : vector<8x1xf32>
    %106 = math.rsqrt %105 : vector<8x1xf32>
    %107 = vector.broadcast %106 : vector<8x1xf32> to vector<8x32xf32>
    %108 = arith.mulf %103, %107 : vector<8x32xf32>
    %109 = vector.broadcast %86 : vector<1x32xf32> to vector<8x32xf32>
    %110 = arith.mulf %108, %109 : vector<8x32xf32>
    %111 = vector.broadcast %88 : vector<1x32xf32> to vector<8x32xf32>
    %112 = arith.addf %110, %111 : vector<8x32xf32>
    %c1 = arith.constant 1 : index
    %c0_65 = arith.constant 0 : index
    %c0_66 = arith.constant 0 : index
    %c0_67 = arith.constant 0 : index
    %113 = vector.load %arg4[%c1, %c0_65, %c0_66, %c0_67] : memref<2x4x32x24xf32, #tpu.memory_space<vmem>>, vector<1x4x32x24xf32>
    %114 = vector.shape_cast %113 : vector<1x4x32x24xf32> to vector<4x32x24xf32>
    %115 = vector.shape_cast %112 : vector<8x32xf32> to vector<1x8x32xf32>
    %116 = vector.broadcast %115 : vector<1x8x32xf32> to vector<4x8x32xf32>
    "tpu.trace_start"() <{level = 10 : i32, message = "hsd,hde->hse"}> : () -> ()
    %cst_68 = arith.constant dense<0.000000e+00> : vector<4x8x24xf32>
    %117 = tpu.matmul %116, %114, %cst_68 {dimension_numbers = #tpu.dot_dimension_numbers<[2], [1], [1], [2], [0, 0, 0, 1, 1, 2], [0], [0]>} : vector<4x8x32xf32>, vector<4x32x24xf32>, vector<4x8x24xf32> -> vector<4x8x24xf32>
    "tpu.trace_stop"() : () -> ()
    %c1_69 = arith.constant 1 : index
    %c0_70 = arith.constant 0 : index
    %c0_71 = arith.constant 0 : index
    %c0_72 = arith.constant 0 : index
    %118 = vector.load %arg5[%c1_69, %c0_70, %c0_71, %c0_72] : memref<2x4x1x24xf32, #tpu.memory_space<vmem>>, vector<1x4x1x24xf32>
    %119 = vector.shape_cast %118 : vector<1x4x1x24xf32> to vector<4x1x24xf32>
    %120 = vector.broadcast %119 : vector<4x1x24xf32> to vector<4x8x24xf32>
    %121 = arith.addf %117, %120 : vector<4x8x24xf32>
    %122 = vector.extract_strided_slice %121 {offsets = [0, 0, 0], sizes = [4, 8, 8], strides = [1, 1, 1]} : vector<4x8x24xf32> to vector<4x8x8xf32>
    %123 = vector.extract_strided_slice %121 {offsets = [0, 0, 8], sizes = [4, 8, 8], strides = [1, 1, 1]} : vector<4x8x24xf32> to vector<4x8x8xf32>
    %124 = vector.extract_strided_slice %121 {offsets = [0, 0, 16], sizes = [4, 8, 8], strides = [1, 1, 1]} : vector<4x8x24xf32> to vector<4x8x8xf32>
    "tpu.trace_start"() <{level = 10 : i32, message = "hqe,hke->hqk"}> : () -> ()
    %cst_73 = arith.constant dense<0.000000e+00> : vector<4x8x8xf32>
    %125 = tpu.matmul %122, %123, %cst_73 {dimension_numbers = #tpu.dot_dimension_numbers<[2], [2], [1], [1], [0, 0, 0, 1, 1, 1], [0], [0]>} : vector<4x8x8xf32>, vector<4x8x8xf32>, vector<4x8x8xf32> -> vector<4x8x8xf32>
    "tpu.trace_stop"() : () -> ()
    %cst_74 = arith.constant dense<0xFF800000> : vector<4x8xf32>
    %126 = vector.multi_reduction <maximumf>, %125, %cst_74 [2] : vector<4x8x8xf32> to vector<4x8xf32>
    %127 = vector.shape_cast %126 : vector<4x8xf32> to vector<4x8x1xf32>
    %128 = vector.broadcast %127 : vector<4x8x1xf32> to vector<4x8x8xf32>
    %129 = arith.subf %125, %128 : vector<4x8x8xf32>
    %130 = math.exp %129 : vector<4x8x8xf32>
    %cst_75 = arith.constant dense<0.000000e+00> : vector<4x8xf32>
    %131 = vector.multi_reduction <add>, %130, %cst_75 [2] : vector<4x8x8xf32> to vector<4x8xf32>
    %132 = vector.shape_cast %131 : vector<4x8xf32> to vector<4x8x1xf32>
    %133 = tpu.reciprocal %132 {approx = true} : vector<4x8x1xf32> -> vector<4x8x1xf32>
    %134 = vector.broadcast %133 : vector<4x8x1xf32> to vector<4x8x8xf32>
    %135 = arith.mulf %130, %134 : vector<4x8x8xf32>
    "tpu.trace_start"() <{level = 10 : i32, message = "hqk,hke->hqe"}> : () -> ()
    %cst_76 = arith.constant dense<0.000000e+00> : vector<4x8x8xf32>
    %136 = tpu.matmul %135, %124, %cst_76 {dimension_numbers = #tpu.dot_dimension_numbers<[2], [1], [1], [2], [0, 0, 0, 1, 1, 2], [0], [0]>} : vector<4x8x8xf32>, vector<4x8x8xf32>, vector<4x8x8xf32> -> vector<4x8x8xf32>
    "tpu.trace_stop"() : () -> ()
    %c1_77 = arith.constant 1 : index
    %c0_78 = arith.constant 0 : index
    %c0_79 = arith.constant 0 : index
    %c0_80 = arith.constant 0 : index
    %137 = vector.load %arg6[%c1_77, %c0_78, %c0_79, %c0_80] : memref<2x4x8x32xf32, #tpu.memory_space<vmem>>, vector<1x4x8x32xf32>
    %138 = vector.shape_cast %137 : vector<1x4x8x32xf32> to vector<4x8x32xf32>
    "tpu.trace_start"() <{level = 10 : i32, message = "hse,hed->hsd"}> : () -> ()
    %cst_81 = arith.constant dense<0.000000e+00> : vector<4x8x32xf32>
    %139 = tpu.matmul %136, %138, %cst_81 {dimension_numbers = #tpu.dot_dimension_numbers<[2], [1], [1], [2], [0, 0, 0, 1, 1, 2], [0], [0]>} : vector<4x8x8xf32>, vector<4x8x32xf32>, vector<4x8x32xf32> -> vector<4x8x32xf32>
    "tpu.trace_stop"() : () -> ()
    %cst_82 = arith.constant dense<0.000000e+00> : vector<8x32xf32>
    %140 = vector.multi_reduction <add>, %139, %cst_82 [0] : vector<4x8x32xf32> to vector<8x32xf32>
    %c1_83 = arith.constant 1 : index
    %c0_84 = arith.constant 0 : index
    %c0_85 = arith.constant 0 : index
    %141 = vector.load %arg7[%c1_83, %c0_84, %c0_85] : memref<2x1x32xf32, #tpu.memory_space<vmem>>, vector<1x1x32xf32>
    %142 = vector.shape_cast %141 : vector<1x1x32xf32> to vector<1x32xf32>
    %143 = vector.broadcast %142 : vector<1x32xf32> to vector<8x32xf32>
    %144 = arith.addf %140, %143 : vector<8x32xf32>
    %145 = arith.addf %112, %144 : vector<8x32xf32>
    %c1_86 = arith.constant 1 : index
    %c0_87 = arith.constant 0 : index
    %c0_88 = arith.constant 0 : index
    %146 = vector.load %arg8[%c1_86, %c0_87, %c0_88] : memref<2x1x32xf32, #tpu.memory_space<vmem>>, vector<1x1x32xf32>
    %147 = vector.shape_cast %146 : vector<1x1x32xf32> to vector<1x32xf32>
    %c1_89 = arith.constant 1 : index
    %c0_90 = arith.constant 0 : index
    %c0_91 = arith.constant 0 : index
    %148 = vector.load %arg9[%c1_89, %c0_90, %c0_91] : memref<2x1x32xf32, #tpu.memory_space<vmem>>, vector<1x1x32xf32>
    %149 = vector.shape_cast %148 : vector<1x1x32xf32> to vector<1x32xf32>
    %cst_92 = arith.constant dense<0.000000e+00> : vector<8xf32>
    %150 = vector.multi_reduction <add>, %145, %cst_92 [1] : vector<8x32xf32> to vector<8xf32>
    %151 = vector.shape_cast %150 : vector<8xf32> to vector<8x1xf32>
    %cst_93 = arith.constant 3.200000e+01 : f32
    %152 = vector.broadcast %cst_93 : f32 to vector<8x1xf32>
    %153 = arith.divf %151, %152 : vector<8x1xf32>
    %154 = vector.broadcast %153 : vector<8x1xf32> to vector<8x32xf32>
    %155 = arith.subf %145, %154 : vector<8x32xf32>
    %156 = vector.broadcast %153 : vector<8x1xf32> to vector<8x32xf32>
    %157 = arith.subf %145, %156 : vector<8x32xf32>
    %158 = arith.mulf %155, %157 : vector<8x32xf32>
    %cst_94 = arith.constant dense<0.000000e+00> : vector<8xf32>
    %159 = vector.multi_reduction <add>, %158, %cst_94 [1] : vector<8x32xf32> to vector<8xf32>
    %160 = vector.shape_cast %159 : vector<8xf32> to vector<8x1xf32>
    %cst_95 = arith.constant 3.200000e+01 : f32
    %161 = vector.broadcast %cst_95 : f32 to vector<8x1xf32>
    %162 = arith.divf %160, %161 : vector<8x1xf32>
    %163 = vector.broadcast %153 : vector<8x1xf32> to vector<8x32xf32>
    %164 = arith.subf %145, %163 : vector<8x32xf32>
    %cst_96 = arith.constant 9.99999974E-6 : f32
    %165 = vector.broadcast %cst_96 : f32 to vector<8x1xf32>
    %166 = arith.addf %162, %165 : vector<8x1xf32>
    %167 = math.rsqrt %166 : vector<8x1xf32>
    %168 = vector.broadcast %167 : vector<8x1xf32> to vector<8x32xf32>
    %169 = arith.mulf %164, %168 : vector<8x32xf32>
    %170 = vector.broadcast %147 : vector<1x32xf32> to vector<8x32xf32>
    %171 = arith.mulf %169, %170 : vector<8x32xf32>
    %172 = vector.broadcast %149 : vector<1x32xf32> to vector<8x32xf32>
    %173 = arith.addf %171, %172 : vector<8x32xf32>
    %c1_97 = arith.constant 1 : index
    %c0_98 = arith.constant 0 : index
    %c0_99 = arith.constant 0 : index
    %174 = vector.load %arg10[%c1_97, %c0_98, %c0_99] : memref<2x32x64xf32, #tpu.memory_space<vmem>>, vector<1x32x64xf32>
    %175 = vector.shape_cast %174 : vector<1x32x64xf32> to vector<32x64xf32>
    %cst_100 = arith.constant dense<0.000000e+00> : vector<8x64xf32>
    %176 = tpu.matmul %173, %175, %cst_100 {dimension_numbers = #tpu.dot_dimension_numbers<[1], [0], [0], [1], [0, 0, 1, 1], [], []>} : vector<8x32xf32>, vector<32x64xf32>, vector<8x64xf32> -> vector<8x64xf32>
    %c1_101 = arith.constant 1 : index
    %c0_102 = arith.constant 0 : index
    %c0_103 = arith.constant 0 : index
    %177 = vector.load %arg11[%c1_101, %c0_102, %c0_103] : memref<2x1x64xf32, #tpu.memory_space<vmem>>, vector<1x1x64xf32>
    %178 = vector.shape_cast %177 : vector<1x1x64xf32> to vector<1x64xf32>
    %179 = vector.broadcast %178 : vector<1x64xf32> to vector<8x64xf32>
    %180 = arith.addf %176, %179 : vector<8x64xf32>
    %cst_104 = arith.constant 0.000000e+00 : f32
    %181 = vector.broadcast %cst_104 : f32 to vector<8x64xf32>
    %182 = arith.maximumf %180, %181 : vector<8x64xf32>
    %c1_105 = arith.constant 1 : index
    %c0_106 = arith.constant 0 : index
    %c0_107 = arith.constant 0 : index
    %183 = vector.load %arg12[%c1_105, %c0_106, %c0_107] : memref<2x64x32xf32, #tpu.memory_space<vmem>>, vector<1x64x32xf32>
    %184 = vector.shape_cast %183 : vector<1x64x32xf32> to vector<64x32xf32>
    %cst_108 = arith.constant dense<0.000000e+00> : vector<8x32xf32>
    %185 = tpu.matmul %182, %184, %cst_108 {dimension_numbers = #tpu.dot_dimension_numbers<[1], [0], [0], [1], [0, 0, 1, 1], [], []>} : vector<8x64xf32>, vector<64x32xf32>, vector<8x32xf32> -> vector<8x32xf32>
    %c1_109 = arith.constant 1 : index
    %c0_110 = arith.constant 0 : index
    %c0_111 = arith.constant 0 : index
    %186 = vector.load %arg13[%c1_109, %c0_110, %c0_111] : memref<2x1x32xf32, #tpu.memory_space<vmem>>, vector<1x1x32xf32>
    %187 = vector.shape_cast %186 : vector<1x1x32xf32> to vector<1x32xf32>
    %188 = vector.broadcast %187 : vector<1x32xf32> to vector<8x32xf32>
    %189 = arith.addf %185, %188 : vector<8x32xf32>
    %190 = arith.addf %173, %189 : vector<8x32xf32>
    %c1_112 = arith.constant 1 : index
    %c0_113 = arith.constant 0 : index
    %c0_114 = arith.constant 0 : index
    %191 = vector.load %arg14[%c1_112, %c0_113, %c0_114] : memref<2x1x32xf32, #tpu.memory_space<vmem>>, vector<1x1x32xf32>
    %192 = vector.shape_cast %191 : vector<1x1x32xf32> to vector<1x32xf32>
    %c1_115 = arith.constant 1 : index
    %c0_116 = arith.constant 0 : index
    %c0_117 = arith.constant 0 : index
    %193 = vector.load %arg15[%c1_115, %c0_116, %c0_117] : memref<2x1x32xf32, #tpu.memory_space<vmem>>, vector<1x1x32xf32>
    %194 = vector.shape_cast %193 : vector<1x1x32xf32> to vector<1x32xf32>
    %cst_118 = arith.constant dense<0.000000e+00> : vector<8xf32>
    %195 = vector.multi_reduction <add>, %190, %cst_118 [1] : vector<8x32xf32> to vector<8xf32>
    %196 = vector.shape_cast %195 : vector<8xf32> to vector<8x1xf32>
    %cst_119 = arith.constant 3.200000e+01 : f32
    %197 = vector.broadcast %cst_119 : f32 to vector<8x1xf32>
    %198 = arith.divf %196, %197 : vector<8x1xf32>
    %199 = vector.broadcast %198 : vector<8x1xf32> to vector<8x32xf32>
    %200 = arith.subf %190, %199 : vector<8x32xf32>
    %201 = vector.broadcast %198 : vector<8x1xf32> to vector<8x32xf32>
    %202 = arith.subf %190, %201 : vector<8x32xf32>
    %203 = arith.mulf %200, %202 : vector<8x32xf32>
    %cst_120 = arith.constant dense<0.000000e+00> : vector<8xf32>
    %204 = vector.multi_reduction <add>, %203, %cst_120 [1] : vector<8x32xf32> to vector<8xf32>
    %205 = vector.shape_cast %204 : vector<8xf32> to vector<8x1xf32>
    %cst_121 = arith.constant 3.200000e+01 : f32
    %206 = vector.broadcast %cst_121 : f32 to vector<8x1xf32>
    %207 = arith.divf %205, %206 : vector<8x1xf32>
    %208 = vector.broadcast %198 : vector<8x1xf32> to vector<8x32xf32>
    %209 = arith.subf %190, %208 : vector<8x32xf32>
    %cst_122 = arith.constant 9.99999974E-6 : f32
    %210 = vector.broadcast %cst_122 : f32 to vector<8x1xf32>
    %211 = arith.addf %207, %210 : vector<8x1xf32>
    %212 = math.rsqrt %211 : vector<8x1xf32>
    %213 = vector.broadcast %212 : vector<8x1xf32> to vector<8x32xf32>
    %214 = arith.mulf %209, %213 : vector<8x32xf32>
    %215 = vector.broadcast %192 : vector<1x32xf32> to vector<8x32xf32>
    %216 = arith.mulf %214, %215 : vector<8x32xf32>
    %217 = vector.broadcast %194 : vector<1x32xf32> to vector<8x32xf32>
    %218 = arith.addf %216, %217 : vector<8x32xf32>
    %cst_123 = arith.constant dense<0.000000e+00> : vector<32xf32>
    %219 = vector.multi_reduction <add>, %218, %cst_123 [0] : vector<8x32xf32> to vector<32xf32>
    %220 = vector.shape_cast %219 : vector<32xf32> to vector<1x32xf32>
    %cst_124 = arith.constant 8.000000e+00 : f32
    %221 = vector.broadcast %cst_124 : f32 to vector<1x32xf32>
    %222 = arith.divf %220, %221 : vector<1x32xf32>
    %c0_125 = arith.constant 0 : index
    %c0_126 = arith.constant 0 : index
    %223 = vector.load %arg16[%c0_125, %c0_126] : memref<32x17xf32, #tpu.memory_space<vmem>>, vector<32x17xf32>
    %cst_127 = arith.constant dense<0.000000e+00> : vector<1x17xf32>
    %224 = tpu.matmul %222, %223, %cst_127 {dimension_numbers = #tpu.dot_dimension_numbers<[1], [0], [0], [1], [0, 0, 1, 1], [], []>} : vector<1x32xf32>, vector<32x17xf32>, vector<1x17xf32> -> vector<1x17xf32>
    %c0_128 = arith.constant 0 : index
    %c0_129 = arith.constant 0 : index
    %225 = vector.load %arg17[%c0_128, %c0_129] : memref<1x17xf32, #tpu.memory_space<vmem>>, vector<1x17xf32>
    %226 = arith.addf %224, %225 : vector<1x17xf32>
    %c0_130 = arith.constant 0 : index
    %c0_131 = arith.constant 0 : index
    %c0_132 = arith.constant 0 : index
    %227 = vector.load %arg18[%c0_130, %c0_131, %c0_132] : memref<1x1x17xf32, #tpu.memory_space<vmem>>, vector<1x1x17xf32>
    %228 = vector.shape_cast %227 : vector<1x1x17xf32> to vector<1x17xf32>
    %229 = vector.shape_cast %226 : vector<1x17xf32> to vector<1x1x17xf32>
    tpu.vector_store %arg18[%c0_130, %c0_131, %c0_132], %229 {strides = array<i32>} : memref<1x1x17xf32, #tpu.memory_space<vmem>>, vector<1x1x17xf32>,
    return
  }
  func.func @transform_0(%arg0: i32) -> (i32, i32, i32) {
    %c0_i32 = arith.constant 0 : i32
    %c0_i32_0 = arith.constant 0 : i32
    %c0_i32_1 = arith.constant 0 : i32
    return %arg0, %c0_i32, %c0_i32_0 : i32, i32, i32
  }
  func.func @transform_1(%arg0: i32) -> (i32, i32) {
    %c0_i32 = arith.constant 0 : i32
    %c0_i32_0 = arith.constant 0 : i32
    %c0_i32_1 = arith.constant 0 : i32
    return %c0_i32, %c0_i32_0 : i32, i32
  }
  func.func @transform_2(%arg0: i32) -> (i32, i32) {
    %c0_i32 = arith.constant 0 : i32
    %c0_i32_0 = arith.constant 0 : i32
    %c0_i32_1 = arith.constant 0 : i32
    return %c0_i32, %c0_i32_0 : i32, i32
  }
  func.func @transform_3(%arg0: i32) -> (i32, i32, i32, i32) {
    %c0_i32 = arith.constant 0 : i32
    %c0_i32_0 = arith.constant 0 : i32
    %c0_i32_1 = arith.constant 0 : i32
    %c0_i32_2 = arith.constant 0 : i32
    %c0_i32_3 = arith.constant 0 : i32
    return %c0_i32, %c0_i32_0, %c0_i32_1, %c0_i32_2 : i32, i32, i32, i32
  }
  func.func @transform_4(%arg0: i32) -> (i32, i32, i32, i32) {
    %c0_i32 = arith.constant 0 : i32
    %c0_i32_0 = arith.constant 0 : i32
    %c0_i32_1 = arith.constant 0 : i32
    %c0_i32_2 = arith.constant 0 : i32
    %c0_i32_3 = arith.constant 0 : i32
    return %c0_i32, %c0_i32_0, %c0_i32_1, %c0_i32_2 : i32, i32, i32, i32
  }
  func.func @transform_5(%arg0: i32) -> (i32, i32, i32, i32) {
    %c0_i32 = arith.constant 0 : i32
    %c0_i32_0 = arith.constant 0 : i32
    %c0_i32_1 = arith.constant 0 : i32
    %c0_i32_2 = arith.constant 0 : i32
    %c0_i32_3 = arith.constant 0 : i32
    return %c0_i32, %c0_i32_0, %c0_i32_1, %c0_i32_2 : i32, i32, i32, i32
  }
  func.func @transform_6(%arg0: i32) -> (i32, i32, i32) {
    %c0_i32 = arith.constant 0 : i32
    %c0_i32_0 = arith.constant 0 : i32
    %c0_i32_1 = arith.constant 0 : i32
    %c0_i32_2 = arith.constant 0 : i32
    return %c0_i32, %c0_i32_0, %c0_i32_1 : i32, i32, i32
  }
  func.func @transform_7(%arg0: i32) -> (i32, i32, i32) {
    %c0_i32 = arith.constant 0 : i32
    %c0_i32_0 = arith.constant 0 : i32
    %c0_i32_1 = arith.constant 0 : i32
    %c0_i32_2 = arith.constant 0 : i32
    return %c0_i32, %c0_i32_0, %c0_i32_1 : i32, i32, i32
  }
  func.func @transform_8(%arg0: i32) -> (i32, i32, i32) {
    %c0_i32 = arith.constant 0 : i32
    %c0_i32_0 = arith.constant 0 : i32
    %c0_i32_1 = arith.constant 0 : i32
    %c0_i32_2 = arith.constant 0 : i32
    return %c0_i32, %c0_i32_0, %c0_i32_1 : i32, i32, i32
  }
  func.func @transform_9(%arg0: i32) -> (i32, i32, i32) {
    %c0_i32 = arith.constant 0 : i32
    %c0_i32_0 = arith.constant 0 : i32
    %c0_i32_1 = arith.constant 0 : i32
    %c0_i32_2 = arith.constant 0 : i32
    return %c0_i32, %c0_i32_0, %c0_i32_1 : i32, i32, i32
  }
  func.func @transform_10(%arg0: i32) -> (i32, i32, i32) {
    %c0_i32 = arith.constant 0 : i32
    %c0_i32_0 = arith.constant 0 : i32
    %c0_i32_1 = arith.constant 0 : i32
    %c0_i32_2 = arith.constant 0 : i32
    return %c0_i32, %c0_i32_0, %c0_i32_1 : i32, i32, i32
  }
  func.func @transform_11(%arg0: i32) -> (i32, i32, i32) {
    %c0_i32 = arith.constant 0 : i32
    %c0_i32_0 = arith.constant 0 : i32
    %c0_i32_1 = arith.constant 0 : i32
    %c0_i32_2 = arith.constant 0 : i32
    return %c0_i32, %c0_i32_0, %c0_i32_1 : i32, i32, i32
  }
  func.func @transform_12(%arg0: i32) -> (i32, i32, i32) {
    %c0_i32 = arith.constant 0 : i32
    %c0_i32_0 = arith.constant 0 : i32
    %c0_i32_1 = arith.constant 0 : i32
    %c0_i32_2 = arith.constant 0 : i32
    return %c0_i32, %c0_i32_0, %c0_i32_1 : i32, i32, i32
  }
  func.func @transform_13(%arg0: i32) -> (i32, i32, i32) {
    %c0_i32 = arith.constant 0 : i32
    %c0_i32_0 = arith.constant 0 : i32
    %c0_i32_1 = arith.constant 0 : i32
    %c0_i32_2 = arith.constant 0 : i32
    return %c0_i32, %c0_i32_0, %c0_i32_1 : i32, i32, i32
  }
  func.func @transform_14(%arg0: i32) -> (i32, i32, i32) {
    %c0_i32 = arith.constant 0 : i32
    %c0_i32_0 = arith.constant 0 : i32
    %c0_i32_1 = arith.constant 0 : i32
    %c0_i32_2 = arith.constant 0 : i32
    return %c0_i32, %c0_i32_0, %c0_i32_1 : i32, i32, i32
  }
  func.func @transform_15(%arg0: i32) -> (i32, i32) {
    %c0_i32 = arith.constant 0 : i32
    %c0_i32_0 = arith.constant 0 : i32
    %c0_i32_1 = arith.constant 0 : i32
    return %c0_i32, %c0_i32_0 : i32, i32
  }
  func.func @transform_16(%arg0: i32) -> (i32, i32) {
    %c0_i32 = arith.constant 0 : i32
    %c0_i32_0 = arith.constant 0 : i32
    %c0_i32_1 = arith.constant 0 : i32
    return %c0_i32, %c0_i32_0 : i32, i32
  }
  func.func @transform_17(%arg0: i32) -> (i32, i32, i32) {
    %c0_i32 = arith.constant 0 : i32
    %c0_i32_0 = arith.constant 0 : i32
    %c0_i32_1 = arith.constant 0 : i32
    return %arg0, %c0_i32, %c0_i32_0 : i32, i32, i32
  }
}

</mosaic_0001>

<bundles_post_ra>
// kernel: tpu_custom_call.1
= control target key start
LH: loop header
LB: loop body
LE: loop exit
PB: predicated region body
PF: predicated region fallthrough
CT: control target
= control target key end

     0   :  { %s5307_s0 = inlined_call_operand.vmem [shape: f32[2,8,24], index: 0, kind: input, shape index: {}]   ;;  %s5308_s1 = inlined_call_operand.vmem [shape: f32[24,32], index: 1, kind: input, shape index: {}]   ;;  %s5309_s2 = inlined_call_operand.vmem [shape: f32[1,32], index: 2, kind: input, shape index: {}]   ;;  %s5310_s3 = inlined_call_operand.vmem [shape: f32[2,4,32,24], index: 3, kind: input, shape index: {}]   ;;  %s5311_s4 = inlined_call_operand.vmem [shape: f32[2,4,1,24], index: 4, kind: input, shape index: {}]   ;;  %s5312_s5 = inlined_call_operand.vmem [shape: f32[2,4,8,32], index: 5, kind: input, shape index: {}]   ;;  %s5313_s6 = inlined_call_operand.vmem [shape: f32[2,1,32], index: 6, kind: input, shape index: {}]   ;;  %s5314_s7 = inlined_call_operand.vmem [shape: f32[2,1,32], index: 7, kind: input, shape index: {}]   ;;  %s5315_s8 = inlined_call_operand.vmem [shape: f32[2,1,32], index: 8, kind: input, shape index: {}]   ;;  %s5316_s9 = inlined_call_operand.vmem [shape: f32[2,32,64], index: 9, kind: input, shape index: {}]   ;;  %s5317_s10 = inlined_call_operand.vmem [shape: f32[2,1,64], index: 10, kind: input, shape index: {}]   ;;  %s5318_s11 = inlined_call_operand.vmem [shape: f32[2,64,32], index: 11, kind: input, shape index: {}]   ;;  %s5319_s12 = inlined_call_operand.vmem [shape: f32[2,1,32], index: 12, kind: input, shape index: {}]   ;;  %s5320_s13 = inlined_call_operand.vmem [shape: f32[2,1,32], index: 13, kind: input, shape index: {}]   ;;  %s5321_s14 = inlined_call_operand.vmem [shape: f32[2,1,32], index: 14, kind: input, shape index: {}]   ;;  %s5322_s15 = inlined_call_operand.vmem [shape: f32[32,17], index: 15, kind: input, shape index: {}]   ;;  %s5323_s16 = inlined_call_operand.vmem [shape: f32[1,17], index: 16, kind: input, shape index: {}]   ;;  %s5324_s17 = inlined_call_operand.hbm [shape: f32[2,1,17], index: 17, kind: output, shape index: {}]  }
   0x1   :  { %5332 = sst [smem:[#allocation11_spill]] %s5307_s0 }
   0x2   :  { %5333 = sst [smem:[#allocation12_spill]] %s5308_s1 }
   0x3   :  { %5334 = sst [smem:[#allocation13_spill]] %s5309_s2 }
   0x4   :  { %22 = vsyncpa [#allocation3], 0 }
   0x5   :  { %24 = vsyncpa [#allocation3 + $0x1], 0  ;;  %s4628_s24 = smov 0   ;;  %s4630_s25 = smov 0  }
   0x6   :  { %s4632_s26 = smov 0   ;;  %s4634_s27 = smov 0  }
   0x7 LB: > { %5335 = sst [smem:[#allocation5_spill]] %s4519_s24  ;;  %s4649_s28 = sadd.s32 4294967295, %s4531_s27   ;;  %s4531_s27 = sphi %s4634_s27, %s5349_s27   ;;  %s4527_s26 = sphi %s4632_s26, %s5351_s26   ;;  %s4523_s25 = sphi %s4630_s25, %s5353_s25   ;;  %s4519_s24 = sphi %s4628_s24, %s5352_s24  }
   0x8   : > { %5336 = sst [smem:[#allocation6_spill]] %s4527_s26  ;;  %s3855_s29 = sadd.s32 4294967294, %s4531_s27  }
   0x9   : > { %5337 = sst [smem:[#allocation7_spill]] %s4531_s27  ;;  %s4653_s0 = sadd.s32 1, %s4531_s27  }
   0xa   : > { %5338 = sst [smem:[#allocation8_spill]] %s4653_s0  ;;  %s399_s30 = sadd.s32 1, %s4527_s26 }
   0xb   : > { %s396_s18 = ssub.s32 %s4531_s27, %s4653_s0  ;;  %p409_p0 = scmp.ne.s32.totalorder %s4527_s26, %s4523_s25 }
   0xc   : > { %p397_p1 = scmp.eq.s32.totalorder %s396_s18, 0  ;;  %p410_p2 = scmp.eq.s32.totalorder %s4649_s28, 1 }
   0xd   : > { %p415_p3 = scmp.ne.s32.totalorder %s4523_s25, %s4519_s24  ;;  %p416_p4 = scmp.eq.s32.totalorder %s3855_s29, 1 }
   0xe   : > { %s4664_s19 = scalar_select %p397_p1, %s4527_s26, %s399_s30  }
   0xf   : > { %p4666_p5 = por %p410_p2, %p409_p0  ;;  %p4670_p6 = por %p416_p4, %p415_p3 }
  0x10   : > { %5339 = sst [smem:[#allocation9_spill]] %s4664_s19  ;;  %p3858_p7 = scmp.ge.s32.totalorder %s4531_s27, 1 }
  0x11   : > { %s5341_s20 = scalar_select %p4670_p6, 1, 0 }
  0x12   : > { %p489_p8 = scmp.lt.s32.totalorder %s4531_s27, 3 }
  0x13   : > { %5342 = sst [smem:[#allocation10_spill]] %s5341_s20 }
  0x14   : > { %p490_p9 = pnand %p3858_p7, %p489_p8 }
  0x15   : > { %s5343_s23 = sld [smem:[#allocation12_spill]] (!%p490_p9)  ;;  %p539_p10 = scmp.lt.s32.totalorder (!%p490_p9), %s4649_s28, 1 }
  0x16   : > { %493 = sbr.rel (%p490_p9) target bundleno = 4923 (0x133b), region = 88  ;;  %s5344_s20 = sld [smem:[#allocation11_spill]] (!%p490_p9) }
  0x17   : > { %s5345_s2 = sld [smem:[#allocation13_spill]] (!%p490_p9)  ;;  %s4535_s26 = smov (!%p490_p9), 120  }
  0x18   : > { %s537_s18 = sand.u32 (!%p490_p9), 1, %s4523_s25   ;;  %s3972_s22 = sshll.u32 (!%p490_p9), %s4649_s28, 4 }
  0x19   : > { %s538_s29 = scalar_lea.vmem (!%p490_p9), [#allocation2], %s537_s18  ;;  %s3788_s27 = scalar_lea.sflag (!%p490_p9), [#allocation3], %s537_s18 }
  0x1b   : > { %v546_v0 = vld [vmem:[%s5343_s23 + $0x10] sm:$0xff]  ;;  %v4533_v1 = vmov 0.0   ;;  %v545_v2 = vld [vmem:[%s5343_s23 + $0x8] sm:$0xff]  ;;  %vm4534_vm0 = vmmov 0   ;;  %v631_v3 = vld [vmem:[%s5310_s3 + $0x18] sm:$0xff]  ;;  %s540_s21 = scalar_select %p539_p10, %s4649_s28, 1 }
  0x1c   : > { %4100 = vmatprep.subr.mxu0 %v4533_v1  ;;  %4106 = vmatprep.mubr.msk.f32.mxu0 %vm4534_vm0, %v4533_v1  ;;  %v630_v4 = vld [vmem:[%s5310_s3 + $0x10] sm:$0xff]  ;;  %v544_v5 = vld [vmem:[%s5343_s23] sm:$0xff]  ;;  %vm554_vm1 = vcmask 195584   ;;  %v635_v6 = vld [vmem:[%s5310_s3 + $0x38] sm:$0xff]  ;;  %vm672_vm2 = vcmask 261120   ;;  %vm959_vm3 = vcmask 64512  }
  0x1d   : > { %4101 = vmatpush3.msra.mxu0 %v546_v0  ;;  %4109 = vmatprep.subr.mxu1 %v4533_v1  ;;  %s3859_s0 = sshll.u32 %s540_s21, 3  ;;  %v629_v7 = vld [vmem:[%s5310_s3 + $0x8] sm:$0xff]  ;;  %v634_v9 = vld [vmem:[%s5310_s3 + $0x30] sm:$0xff]  ;;  %v628_v11 = vld [vmem:[%s5310_s3] sm:$0xff]  ;;  %vm2055_vm4 = vcmask 523264   ;;  %s3800_s21 = sshll.u32 %s538_s29, 4  ;;  %s3801_s21 = int_to_ptr.vmem [resolvable:$true] %s3800_s21 }
  0x1e   : > { %4102 = vmatprep.subr.mxu0 %v4533_v1  ;;  %4110 = vmatpush3.msra.mxu1 %v631_v3  ;;  %s542_s24 = scalar_lea.vmem %s5344_s20, %s3859_s0  ;;  %v633_v10 = vld [vmem:[%s5310_s3 + $0x28] sm:$0xff]  ;;  %v632_v12 = vld [vmem:[%s5310_s3 + $0x20] sm:$0xff]  ;;  %v639_v16 = vld [vmem:[%s5310_s3 + $0x58] sm:$0xff]  ;;  %s4536_s0 = smov 112   ;;  %vm3785_vm5 = vcmask 131072  }
  0x1f   : > { %4103 = vmatpush3.msra.mxu0 %v545_v2  ;;  %4111 = vmatprep.subr.mxu1 %v4533_v1  ;;  %v543_v8 = vld [vmem:[%s542_s24] sm:$0xff]  ;;  %v643_v17 = vld [vmem:[%s5310_s3 + $0x78] sm:$0xff]  ;;  %v638_v19 = vld [vmem:[%s5310_s3 + $0x50] sm:$0xff]  ;;  %s5272_s24 = scalar_lea.hbm %s5324_s17, %s3972_s22  ;;  %s4471_s19 = scalar_lea.vmem %s3801_s21, 16 }
  0x20   : > { %4104 = vmatprep.subr.mxu0 %v4533_v1  ;;  %4112 = vmatpush3.msra.mxu1 %v630_v4  ;;  %v3860_v13 = vld [vmem:[%s5345_s2] ss:$0 sm:$0xff]  ;;  %v642_v20 = vld [vmem:[%s5310_s3 + $0x70] sm:$0xff]  ;;  %v637_v21 = vld [vmem:[%s5310_s3 + $0x48] sm:$0xff]  ;;  %p4472_p11 = scmp.ne.s32.totalorder %s3801_s21, %s4471_s19  ;;  %s4537_s28 = smov [#allocation2]  }
  0x21   : > { %4105 = vmatpush3.msra.mxu0 %v544_v5  ;;  %4113 = vmatprep.subr.mxu1 %v4533_v1  ;;  %v641_v22 = vld [vmem:[%s5310_s3 + $0x68] sm:$0xff]  ;;  %v636_v23 = vld [vmem:[%s5310_s3 + $0x40] sm:$0xff] }
  0x22   : > { %4107 = vmatmul.mubr.msk.f32.vlgmr.msra.gmra.mxu0 %vm554_vm1, %v543_v8  ;;  %4120 = vmatprep.subr.mxu0 %v4533_v1  ;;  %v640_v24 = vld [vmem:[%s5310_s3 + $0x60] sm:$0xff]  ;;  %p4473_p12 = pnand %p4472_p11, %p4666_p5 }
  0x23   : > { %4121 = vmatpush3.msra.mxu0 %v635_v6  ;;  %4114 = vmatpush3.msra.mxu1 %v629_v7  ;;  %v3862_v25 = vld [vmem:[%s5311_s4] ss:$0 sm:$0xff]  ;;  %v3863_v29 = vld [vmem:[%s5311_s4 + $0x1] ss:$0 sm:$0xff]  ;;  %v3864_v33 = vld [vmem:[%s5311_s4 + $0x2] ss:$0 sm:$0xff] }
  0x24   : > { %4122 = vmatprep.subr.mxu0 %v4533_v1  ;;  %4115 = vmatprep.subr.mxu1 %v4533_v1  ;;  %v3865_v37 = vld [vmem:[%s5311_s4 + $0x3] ss:$0 sm:$0xff]  ;;  %p4474_p13 = pneg %p4473_p12 }
  0x25   : > { %4123 = vmatpush3.msra.mxu0 %v634_v9  ;;  %4117 = vmatprep.mubr.msk.f32.mxu1 %vm4534_vm0, %v4533_v1 }
  0x26   : > { %4124 = vmatprep.subr.mxu0 %v4533_v1  ;;  %4128 = vmatprep.mubr.msk.f32.mxu0 %vm4534_vm0, %v4533_v1 }
  0x27   : > { %4125 = vmatpush3.msra.mxu0 %v633_v10  ;;  %4116 = vmatpush3.msra.mxu1 %v628_v11 }
  0x28   : > { %4126 = vmatprep.subr.mxu0 %v4533_v1  ;;  %4131 = vmatprep.subr.mxu1 %v4533_v1 }
  0x29   : > { %4127 = vmatpush3.msra.mxu0 %v632_v12 }
  0x2a   : > { %4142 = vmatprep.subr.mxu0 %v4533_v1 }
  0xe2   : > { %v624_v14 = vpop.f32.mrf.mxu0 }
  0xe3   : > { %v4736_v15 = vadd.f32 %v3860_v13, %v624_v14 }
  0xe4   : > { %v4108_v18 = vpop.f32.mrf.mxu0 }
  0xe5   : > { %4118 = vmatmul.mubr.msk.f32.vlgmr.msra.gmra.mxu1 %vm672_vm2, %v4736_v15  ;;  %4129 = vmatmul.mubr.msk.f32.vlgmr.msra.gmra.mxu0 %vm672_vm2, %v4736_v15 }
  0xe6   : > { %4132 = vmatpush3.msra.mxu1 %v639_v16  ;;  %4143 = vmatpush3.msra.mxu0 %v643_v17 }
  0xe7   : > { %4133 = vmatprep.subr.mxu1 %v4533_v1  ;;  %4144 = vmatprep.subr.mxu0 %v4533_v1 }
  0xe8   : > { %4134 = vmatpush3.msra.mxu1 %v638_v19  ;;  %4145 = vmatpush3.msra.mxu0 %v642_v20 }
  0xe9   : > { %4135 = vmatprep.subr.mxu1 %v4533_v1  ;;  %4146 = vmatprep.subr.mxu0 %v4533_v1 }
  0xea   : > { %4136 = vmatpush3.msra.mxu1 %v637_v21  ;;  %4147 = vmatpush3.msra.mxu0 %v641_v22 }
  0xeb   : > { %4137 = vmatprep.subr.mxu1 %v4533_v1  ;;  %4148 = vmatprep.subr.mxu0 %v4533_v1 }
  0xec   : > { %4138 = vmatpush3.msra.mxu1 %v636_v23  ;;  %4139 = vmatprep.mubr.msk.f32.mxu1 %vm4534_vm0, %v4533_v1 }
  0xed   : > { %4149 = vmatpush3.msra.mxu0 %v640_v24  ;;  %4150 = vmatprep.mubr.msk.f32.mxu0 %vm4534_vm0, %v4533_v1 }
  0xee   : > { %4140 = vmatmul.mubr.msk.f32.vlgmr.msra.gmra.mxu1 %vm672_vm2, %v4736_v15  ;;  %4151 = vmatmul.mubr.msk.f32.vlgmr.msra.gmra.mxu0 %vm672_vm2, %v4736_v15 }
  0xef   : > { %4153 = vmatprep.subr.mxu1 %v4533_v1  ;;  %4155 = vmatprep.mubr.msk.f32.mxu1 %vm4534_vm0, %v4533_v1 }
  0xf0   : > { %4163 = vmatprep.subr.mxu0 %v4533_v1  ;;  %4165 = vmatprep.mubr.msk.f32.mxu0 %vm4534_vm0, %v4533_v1 }
 0x1a5   : > { %v742_v26 = vpop.f32.mrf.mxu1  ;;  %v812_v27 = vpop.f32.mrf.mxu0 }
 0x1a6   : > { %v743_v28 = vadd.f32 %v3862_v25, %v742_v26  ;;  %v4793_v32 = vadd.f32 %v3863_v29, %v812_v27 }
 0x1a7   : > { %v4119_v30 = vpop.f32.mrf.mxu1  ;;  %v4130_v31 = vpop.f32.mrf.mxu0 }
 0x1a8   : > { %957 = vrot.lane.b32.xlu0 %v743_v28, %s4535_s26  ;;  %v1613_v31 = vld [vmem:[%s5312_s5] sm:$0xff] }
 0x1ac   : > { %1035 = vrot.lane.b32.xlu0 %v4793_v32, %s4535_s26 }
 0x1ae   : > { %v882_v34 = vpop.f32.mrf.mxu1  ;;  %v952_v35 = vpop.f32.mrf.mxu0 }
 0x1af   : > { %v4800_v36 = vadd.f32 %v3864_v33, %v882_v34  ;;  %v4807_v40 = vadd.f32 %v3865_v37, %v952_v35  ;;  %v1615_v33 = vld [vmem:[%s5312_s5 + $0x10] sm:$0xff] }
 0x1b0   : > { %v4141_v38 = vpop.f32.mrf.mxu1  ;;  %v4152_v39 = vpop.f32.mrf.mxu0 }
 0x1b1   : > { %1112 = vrot.lane.b32.xlu1 %v4800_v36, %s4535_s26 }
 0x1b5   : > { %1189 = vrot.lane.b32.xlu1 %v4807_v40, %s4535_s26 }
 0x21a   : > { %v958_v41 = vpop.permute.xlu0 %957 }
 0x21b   : > { %4154 = vmatpush3.xpose.msk.msra.mxu1 %vm959_vm3, %v958_v41 }
 0x21c   : > { %4158 = vmatprep.subr.mxu1 %v4533_v1 }
 0x21e   : > { %4156 = vmatmul.mubr.msk.f32.vlgmr.msra.gmra.mxu1 %vm959_vm3, %v743_v28  ;;  %v1036_v42 = vpop.permute.xlu0 %1035 }
 0x21f   : > { %4159 = vmatpush3.xpose.msk.msra.mxu1 %vm959_vm3, %v1036_v42  ;;  %4160 = vmatprep.mubr.msk.f32.mxu1 %vm4534_vm0, %v4533_v1 }
 0x220   : > { %4168 = vmatprep.subr.mxu1 %v4533_v1 }
 0x222   : > { %4161 = vmatmul.mubr.msk.f32.vlgmr.msra.gmra.mxu1 %vm959_vm3, %v4793_v32 }
 0x223   : > { %v1113_v43 = vpop.permute.xlu1 %1112  ;;  %4170 = vmatprep.mubr.msk.f32.mxu1 %vm4534_vm0, %v4533_v1 }
 0x224   : > { %4164 = vmatpush3.xpose.msk.msra.mxu0 %vm959_vm3, %v1113_v43 }
 0x225   : > { %4173 = vmatprep.subr.mxu0 %v4533_v1 }
 0x227   : > { %4166 = vmatmul.mubr.msk.f32.vlgmr.msra.gmra.mxu0 %vm959_vm3, %v4800_v36  ;;  %v1190_v44 = vpop.permute.xlu1 %1189 }
 0x228   : > { %4169 = vmatpush3.xpose.msk.msra.mxu1 %vm959_vm3, %v1190_v44  ;;  %4175 = vmatprep.mubr.msk.f32.mxu0 %vm4534_vm0, %v4533_v1 }
 0x229   : > { %4178 = vmatprep.subr.mxu1 %v4533_v1 }
 0x22b   : > { %4171 = vmatmul.mubr.msk.f32.vlgmr.msra.gmra.mxu1 %vm959_vm3, %v4807_v40 }
 0x22c   : > { %4180 = vmatprep.mubr.msk.f32.mxu1 %vm4534_vm0, %v4533_v1 }
 0x2de   : > { %v1030_v45 = vpop.f32.mrf.mxu1 }
 0x2df   : > { %v1265_v46 = vsel %vm959_vm3, %v1030_v45, -inf }
 0x2e0   : > { %v4157_v47 = vpop.f32.mrf.mxu1  ;;  %1266 = vmax.xlane.f32.xlu0 %v1265_v46 }
 0x2e2   : > { %v1107_v48 = vpop.f32.mrf.mxu1 }
 0x2e3   : > { %v1268_v49 = vsel %vm959_vm3, %v1107_v48, -inf }
 0x2e4   : > { %v4162_v50 = vpop.f32.mrf.mxu1  ;;  %1269 = vmax.xlane.f32.xlu1 %v1268_v49 }
 0x2e7   : > { %v1184_v51 = vpop.f32.mrf.mxu0 }
 0x2e8   : > { %v1271_v52 = vsel %vm959_vm3, %v1184_v51, -inf }
 0x2e9   : > { %1272 = vmax.xlane.f32.xlu0 %v1271_v52  ;;  %v4167_v53 = vpop.f32.mrf.mxu0 }
 0x2eb   : > { %v1261_v54 = vpop.f32.mrf.mxu1 }
 0x2ec   : > { %v1274_v55 = vsel %vm959_vm3, %v1261_v54, -inf }
 0x2ed   : > { %v4172_v56 = vpop.f32.mrf.mxu1  ;;  %1275 = vmax.xlane.f32.xlu0 %v1274_v55 }
 0x2ee   : > { %v3886_v56 = vld [vmem:[%s5313_s6] ss:$0 sm:$0xff] }
 0x2f5   : > { %1309 = vrot.lane.b32.xlu1 %v743_v28, %s4536_s0 }
 0x369   : > { %v1267_v57 = vpop.xlane.xlu0 %1266 }
 0x36a   : > { %v1277_v58 = vsub.f32 %v1030_v45, %v1267_v57 }
 0x36c   : > { %v1281_v59 = vmul.f32 1.442695, %v1277_v58 }
 0x36d   : > { %v1270_v60 = vpop.xlane.xlu1 %1269 }
 0x36e   : > { %4431 = vpow2.f32 %v1281_v59  ;;  %v1278_v61 = vsub.f32 %v1107_v48, %v1270_v60 }
 0x370   : > { %v1283_v62 = vmul.f32 1.442695, %v1278_v61 }
 0x371   : > { %v1310_v63 = vpop.permute.xlu1 %1309 }
 0x372   : > { %4433 = vpow2.f32 %v1283_v62  ;;  %v1273_v0 = vpop.xlane.xlu0 %1272  ;;  %4174 = vmatpush3.msra.mxu0 %v1310_v63 }
 0x373   : > { %v1279_v2 = vsub.f32 %v1184_v51, %v1273_v0  ;;  %4183 = vmatprep.subr.mxu0 %v4533_v1 }
 0x375   : > { %v1285_v3 = vmul.f32 1.442695, %v1279_v2 }
 0x376   : > { %v1276_v4 = vpop.xlane.xlu0 %1275 }
 0x377   : > { %4435 = vpow2.f32 %v1285_v3  ;;  %v1280_v5 = vsub.f32 %v1261_v54, %v1276_v4  ;;  %v1958_v4 = vld [vmem:[%s5316_s9 + $0x18] sm:$0xff] }
 0x379   : > { %v1287_v6 = vmul.f32 1.442695, %v1280_v5  ;;  %v1956_v5 = vld [vmem:[%s5316_s9 + $0x8] sm:$0xff] }
 0x37b   : > { %v4432_v7 = vpop.eup %4431  ;;  %4437 = vpow2.f32 %v1287_v6  ;;  %v1955_v6 = vld [vmem:[%s5316_s9] sm:$0xff] }
 0x37c   : > { %v1289_v8 = vsel %vm959_vm3, %v4432_v7, 0.0 }
 0x37d   : > { %1290 = vadd.xlane.f32.xlu1 %v1289_v8  ;;  %v2046_v8 = vld [vmem:[%s5318_s11 + $0x30] sm:$0xff] }
 0x37f   : > { %v4434_v9 = vpop.eup %4433 }
 0x380   : > { %v1292_v10 = vsel %vm959_vm3, %v4434_v9, 0.0 }
 0x381   : > { %1293 = vadd.xlane.f32.xlu0 %v1292_v10  ;;  %v2044_v10 = vld [vmem:[%s5318_s11 + $0x20] sm:$0xff] }
 0x384   : > { %v4436_v11 = vpop.eup %4435 }
 0x385   : > { %v1295_v12 = vsel %vm959_vm3, %v4436_v11, 0.0 }
 0x386   : > { %1296 = vadd.xlane.f32.xlu1 %v1295_v12 }
 0x388   : > { %v4438_v13 = vpop.eup %4437 }
 0x389   : > { %v1298_v14 = vsel %vm959_vm3, %v4438_v13, 0.0 }
 0x38a   : > { %1299 = vadd.xlane.f32.xlu0 %v1298_v14 }
 0x397   : > { %1461 = vrot.lane.b32.xlu1 %v4800_v36, %s4536_s0  ;;  %v1616_v36 = vld [vmem:[%s5312_s5 + $0x18] sm:$0xff] }
 0x39b   : > { %1537 = vrot.lane.b32.xlu1 %v4807_v40, %s4536_s0 }
 0x3a0   : > { %1385 = vrot.lane.b32.xlu0 %v4793_v32, %s4536_s0  ;;  %v1614_v32 = vld [vmem:[%s5312_s5 + $0x8] sm:$0xff] }
 0x406   : > { %v1291_v16 = vpop.xlane.xlu1 %1290 }
 0x407   : > { %4439 = vrcp.f32 %v1291_v16 }
 0x40a   : > { %v1294_v17 = vpop.xlane.xlu0 %1293 }
 0x40b   : > { %4441 = vrcp.f32 %v1294_v17  ;;  %v3887_v17 = vld [vmem:[%s5314_s7] ss:$0 sm:$0xff] }
 0x40f   : > { %v1297_v18 = vpop.xlane.xlu1 %1296 }
 0x410   : > { %4443 = vrcp.f32 %v1297_v18 }
 0x413   : > { %v1300_v19 = vpop.xlane.xlu0 %1299  ;;  %v1462_v21 = vpop.permute.xlu1 %1461 }
 0x414   : > { %v4440_v20 = vpop.eup %4439  ;;  %4445 = vrcp.f32 %v1300_v19  ;;  %v3888_v19 = vld [vmem:[%s5315_s8] ss:$0 sm:$0xff] }
 0x415   : > { %v1305_v22 = vmul.f32 %v4440_v20, %v4432_v7  ;;  %v2047_v7 = vld [vmem:[%s5318_s11 + $0x38] sm:$0xff] }
 0x417   : > { %v1386_v23 = vpop.permute.xlu0 %1385  ;;  %4176 = vmatmul.mubr.msk.f32.vlgmr.msra.gmra.mxu0 %vm959_vm3, %v1305_v22  ;;  %v1538_v26 = vpop.permute.xlu1 %1537  ;;  %v2042_v22 = vld [vmem:[%s5318_s11 + $0x10] sm:$0xff] }
 0x418   : > { %v4442_v24 = vpop.eup %4441  ;;  %4179 = vmatpush3.msra.mxu1 %v1386_v23  ;;  %4184 = vmatpush3.msra.mxu0 %v1462_v21  ;;  %v2041_v23 = vld [vmem:[%s5318_s11 + $0x8] sm:$0xff] }
 0x419   : > { %4188 = vmatprep.subr.mxu1 %v4533_v1  ;;  %v1306_v25 = vmul.f32 %v4442_v24, %v4434_v9  ;;  %4185 = vmatprep.mubr.msk.f32.mxu0 %vm4534_vm0, %v4533_v1  ;;  %v2045_v9 = vld [vmem:[%s5318_s11 + $0x28] sm:$0xff]  ;;  %v2040_v24 = vld [vmem:[%s5318_s11] sm:$0xff] }
 0x41a   : > { %4193 = vmatprep.subr.mxu0 %v4533_v1 }
 0x41b   : > { %4181 = vmatmul.mubr.msk.f32.vlgmr.msra.gmra.mxu1 %vm959_vm3, %v1306_v25  ;;  %v3889_v25 = vld [vmem:[%s5317_s10] ss:$0 sm:$0xff] }
 0x41c   : > { %4189 = vmatpush3.msra.mxu1 %v1538_v26  ;;  %4190 = vmatprep.mubr.msk.f32.mxu1 %vm4534_vm0, %v4533_v1 }
 0x41d   : > { %v4444_v27 = vpop.eup %4443  ;;  %4198 = vmatprep.subr.mxu1 %v4533_v1 }
 0x41e   : > { %v1307_v28 = vmul.f32 %v4444_v27, %v4436_v11  ;;  %v2043_v11 = vld [vmem:[%s5318_s11 + $0x18] sm:$0xff] }
 0x420   : > { %4186 = vmatmul.mubr.msk.f32.vlgmr.msra.gmra.mxu0 %vm959_vm3, %v1307_v28 }
 0x421   : > { %v4446_v29 = vpop.eup %4445  ;;  %4195 = vmatprep.mubr.msk.f32.mxu0 %vm4534_vm0, %v4533_v1  ;;  %4194 = vmatpush3.msra.mxu0 %v1613_v31 }
 0x422   : > { %v1308_v30 = vmul.f32 %v4446_v29, %v4438_v13  ;;  %4203 = vmatprep.subr.mxu0 %v4533_v1 }
 0x424   : > { %4191 = vmatmul.mubr.msk.f32.vlgmr.msra.gmra.mxu1 %vm959_vm3, %v1308_v30  ;;  %v3891_v30 = vld [vmem:[%s5319_s12] ss:$0 sm:$0xff] }
 0x425   : > { %4200 = vmatprep.mubr.msk.f32.mxu1 %vm4534_vm0, %v4533_v1  ;;  %4199 = vmatpush3.msra.mxu1 %v1614_v32 }
 0x426   : > { %4208 = vmatprep.subr.mxu1 %v4533_v1 }
 0x4d7   : > { %v1381_v34 = vpop.f32.mrf.mxu0 }
 0x4d8   : > { %4196 = vmatmul.mubr.msk.f32.vlgmr.msra.gmra.mxu0 %vm959_vm3, %v1381_v34 }
 0x4d9   : > { %v4177_v35 = vpop.f32.mrf.mxu0  ;;  %4204 = vmatpush3.msra.mxu0 %v1615_v33  ;;  %4205 = vmatprep.mubr.msk.f32.mxu0 %vm4534_vm0, %v4533_v1 }
 0x4da   : > { %4213 = vmatprep.subr.mxu0 %v4533_v1 }
 0x4db   : > { %v1457_v37 = vpop.f32.mrf.mxu1 }
 0x4dc   : > { %4201 = vmatmul.mubr.msk.f32.vlgmr.msra.gmra.mxu1 %vm959_vm3, %v1457_v37 }
 0x4dd   : > { %v4182_v38 = vpop.f32.mrf.mxu1  ;;  %4209 = vmatpush3.msra.mxu1 %v1616_v36  ;;  %4210 = vmatprep.mubr.msk.f32.mxu1 %vm4534_vm0, %v4533_v1 }
 0x4de   : > { %4224 = vmatprep.subr.mxu1 %v4533_v1 }
 0x4e0   : > { %v1533_v39 = vpop.f32.mrf.mxu0 }
 0x4e1   : > { %4206 = vmatmul.mubr.msk.f32.vlgmr.msra.gmra.mxu0 %vm959_vm3, %v1533_v39 }
 0x4e2   : > { %v4187_v40 = vpop.f32.mrf.mxu0  ;;  %4221 = vmatprep.mubr.msk.f32.mxu0 %vm4534_vm0, %v4533_v1  ;;  %4214 = vmatpush3.msra.mxu0 %v1958_v4 }
 0x4e3   : > { %4215 = vmatprep.subr.mxu0 %v4533_v1 }
 0x4e4   : > { %v1609_v41 = vpop.f32.mrf.mxu1 }
 0x4e5   : > { %4211 = vmatmul.mubr.msk.f32.vlgmr.msra.gmra.mxu1 %vm959_vm3, %v1609_v41  ;;  %v3898_v41 = vld [vmem:[%s5310_s3 + $0x98] sm:$0xff] }
 0x4e6   : > { %v4192_v42 = vpop.f32.mrf.mxu1  ;;  %4240 = vmatprep.mubr.msk.f32.mxu1 %vm4534_vm0, %v4533_v1  ;;  %4225 = vmatpush3.msra.mxu1 %v2047_v7 }
 0x4e7   : > { %4226 = vmatprep.subr.mxu1 %v4533_v1  ;;  %v3906_v42 = vld [vmem:[%s5310_s3 + $0xd8] sm:$0xff] }
 0x4e8   : > { %4227 = vmatpush3.msra.mxu1 %v2046_v8 }
 0x4e9   : > { %4228 = vmatprep.subr.mxu1 %v4533_v1 }
 0x4ea   : > { %4229 = vmatpush3.msra.mxu1 %v2045_v9 }
 0x4eb   : > { %4230 = vmatprep.subr.mxu1 %v4533_v1 }
 0x4ec   : > { %4231 = vmatpush3.msra.mxu1 %v2044_v10  ;;  %v3916_v10 = vld [vmem:[%s5311_s4 + $0x5] ss:$0 sm:$0xff] }
 0x4ed   : > { %4232 = vmatprep.subr.mxu1 %v4533_v1 }
 0x4ee   : > { %4233 = vmatpush3.msra.mxu1 %v2043_v11 }
 0x4ef   : > { %4234 = vmatprep.subr.mxu1 %v4533_v1 }
 0x4f0   : > { %4235 = vmatpush3.msra.mxu1 %v2042_v22 }
 0x4f1   : > { %4236 = vmatprep.subr.mxu1 %v4533_v1 }
 0x4f2   : > { %4237 = vmatpush3.msra.mxu1 %v2041_v23 }
 0x4f3   : > { %4238 = vmatprep.subr.mxu1 %v4533_v1 }
 0x4f4   : > { %4239 = vmatpush3.msra.mxu1 %v2040_v24 }
 0x4f5   : > { %4265 = vmatprep.subr.mxu1 %v4533_v1 }
 0x598   : > { %v1686_v43 = vpop.f32.mrf.mxu0 }
 0x599   : > { %v1909_v48 = vsel %vm672_vm2, %v1686_v43, 0.0  ;;  %v3897_v43 = vld [vmem:[%s5310_s3 + $0x90] sm:$0xff] }
 0x59a   : > { %v4197_v44 = vpop.f32.mrf.mxu0 }
 0x59b   : > { %v3905_v44 = vld [vmem:[%s5310_s3 + $0xd0] sm:$0xff] }
 0x59c   : > { %v1759_v45 = vpop.f32.mrf.mxu1 }
 0x59d   : > { %v1910_v46 = vsel %vm672_vm2, %v1759_v45, 0.0  ;;  %v3896_v45 = vld [vmem:[%s5310_s3 + $0x88] sm:$0xff] }
 0x59e   : > { %v4202_v47 = vpop.f32.mrf.mxu1  ;;  %v1911_v49 = vadd.f32 %v1910_v46, %v1909_v48  ;;  %v3904_v46 = vld [vmem:[%s5310_s3 + $0xc8] sm:$0xff]  ;;  %v3903_v48 = vld [vmem:[%s5310_s3 + $0xc0] sm:$0xff] }
 0x59f   : > { %v3895_v47 = vld [vmem:[%s5310_s3 + $0x80] sm:$0xff] }
 0x5a1   : > { %v1832_v50 = vpop.f32.mrf.mxu0 }
 0x5a2   : > { %v1912_v51 = vsel %vm672_vm2, %v1832_v50, 0.0 }
 0x5a3   : > { %v4207_v52 = vpop.f32.mrf.mxu0  ;;  %v1913_v53 = vadd.f32 %v1912_v51, %v1911_v49 }
 0x5a5   : > { %v1905_v54 = vpop.f32.mrf.mxu1 }
 0x5a6   : > { %v1914_v55 = vsel %vm672_vm2, %v1905_v54, 0.0 }
 0x5a7   : > { %v1915_v57 = vadd.f32 %v1914_v55, %v1913_v53  ;;  %v4212_v58 = vpop.f32.mrf.mxu1  ;;  %v3893_v53 = vld [vmem:[%s5320_s13] ss:$0 sm:$0xff] }
 0x5a8   : > { %v3894_v55 = vld [vmem:[%s5321_s14] ss:$0 sm:$0xff]  ;;  %v3902_v58 = vld [vmem:[%s5310_s3 + $0xb8] sm:$0xff] }
 0x5a9   : > { %v1923_v59 = vadd.f32 %v3886_v56, %v1915_v57 }
 0x5ab   : > { %v1924_v60 = vadd.f32 %v1923_v59, %v4736_v15  ;;  %v1957_v15 = vld [vmem:[%s5316_s9 + $0x10] sm:$0xff] }
 0x5ac   : > { %4216 = vmatpush3.msra.mxu0 %v1957_v15  ;;  %v3901_v59 = vld [vmem:[%s5310_s3 + $0xb0] sm:$0xff] }
 0x5ad   : > { %v1927_v61 = vsel %vm672_vm2, %v1924_v60, 0.0  ;;  %4217 = vmatprep.subr.mxu0 %v4533_v1 }
 0x5ae   : > { %1928 = vadd.xlane.f32.xlu0 %v1927_v61  ;;  %4218 = vmatpush3.msra.mxu0 %v1956_v5  ;;  %v3899_v61 = vld [vmem:[%s5310_s3 + $0xa0] sm:$0xff] }
 0x5af   : > { %4219 = vmatprep.subr.mxu0 %v4533_v1 }
 0x5b0   : > { %4220 = vmatpush3.msra.mxu0 %v1955_v6  ;;  %v3917_v6 = vld [vmem:[%s5311_s4 + $0x6] ss:$0 sm:$0xff] }
 0x5b1   : > { %4243 = vmatprep.subr.mxu0 %v4533_v1 }
 0x637   : > { %v1929_v62 = vpop.xlane.xlu0 %1928 }
 0x638   : > { %v1931_v63 = vmul.f32 0.03125, %v1929_v62  ;;  %v3910_v62 = vld [vmem:[%s5310_s3 + $0xf8] sm:$0xff] }
 0x63a   : > { %v1932_v0 = vsub.f32 %v1924_v60, %v1931_v63  ;;  %v3900_v60 = vld [vmem:[%s5310_s3 + $0xa8] sm:$0xff]  ;;  %v3909_v63 = vld [vmem:[%s5310_s3 + $0xf0] sm:$0xff] }
 0x63c   : > { %v1933_v2 = vmul.f32 %v1932_v0, %v1932_v0 }
 0x63e   : > { %v1934_v3 = vsel %vm672_vm2, %v1933_v2, 0.0  ;;  %v3907_v2 = vld [vmem:[%s5310_s3 + $0xe0] sm:$0xff] }
 0x63f   : > { %1935 = vadd.xlane.f32.xlu1 %v1934_v3  ;;  %v3915_v3 = vld [vmem:[%s5311_s4 + $0x4] ss:$0 sm:$0xff] }
 0x6c8   : > { %v1936_v12 = vpop.xlane.xlu1 %1935 }
 0x6c9   : > { %v1937_v13 = vmul.f32 0.03125, %v1936_v12 }
 0x6cb   : > { %v1938_v14 = vadd.f32 1e-05, %v1937_v13 }
 0x6cd   : > { %4447 = vrsqrt.f32 %v1938_v14  ;;  %v3918_v14 = vld [vmem:[%s5311_s4 + $0x7] ss:$0 sm:$0xff] }
 0x6da   : > { %v4448_v16 = vpop.eup %4447 }
 0x6db   : > { %v1940_v18 = vmul.f32 %v4448_v16, %v1932_v0  ;;  %v3908_v0 = vld [vmem:[%s5310_s3 + $0xe8] sm:$0xff] }
 0x6dd   : > { %v1947_v20 = vmul.f32 %v3887_v17, %v1940_v18 }
 0x6df   : > { %v1954_v21 = vadd.f32 %v3888_v19, %v1947_v20 }
 0x6e1   : > { %4222 = vmatmul.mubr.msk.f32.vlgmr.msra.gmra.mxu0 %vm672_vm2, %v1954_v21 }
 0x6e2   : > { %4251 = vmatprep.mubr.msk.f32.mxu0 %vm4534_vm0, %v4533_v1  ;;  %4244 = vmatpush3.msra.mxu0 %v3898_v41 }
 0x6e3   : > { %4245 = vmatprep.subr.mxu0 %v4533_v1 }
 0x6e4   : > { %4246 = vmatpush3.msra.mxu0 %v3897_v43 }
 0x6e5   : > { %4247 = vmatprep.subr.mxu0 %v4533_v1 }
 0x6e6   : > { %4248 = vmatpush3.msra.mxu0 %v3896_v45 }
 0x6e7   : > { %4249 = vmatprep.subr.mxu0 %v4533_v1 }
 0x6e8   : > { %4250 = vmatpush3.msra.mxu0 %v3895_v47 }
 0x6e9   : > { %4254 = vmatprep.subr.mxu0 %v4533_v1 }
 0x7a1   : > { %v2035_v26 = vpop.f32.mrf.mxu0 }
 0x7a2   : > { %v2036_v27 = vadd.f32 %v3889_v25, %v2035_v26 }
 0x7a3   : > { %v4223_v28 = vpop.f32.mrf.mxu0 }
 0x7a4   : > { %v2039_v29 = vmax.f32 %v2036_v27, 0.0 }
 0x7a6   : > { %4241 = vmatmul.mubr.msk.f32.vlgmr.msra.gmra.mxu1 %vm2055_vm4, %v2039_v29 }
 0x7a7   : > { %4273 = vmatprep.mubr.msk.f32.mxu1 %vm4534_vm0, %v4533_v1  ;;  %4266 = vmatpush3.msra.mxu1 %v3906_v42 }
 0x7a8   : > { %4267 = vmatprep.subr.mxu1 %v4533_v1 }
 0x7a9   : > { %4268 = vmatpush3.msra.mxu1 %v3905_v44 }
 0x7aa   : > { %4269 = vmatprep.subr.mxu1 %v4533_v1 }
 0x7ab   : > { %4270 = vmatpush3.msra.mxu1 %v3904_v46 }
 0x7ac   : > { %4271 = vmatprep.subr.mxu1 %v4533_v1 }
 0x7ad   : > { %4272 = vmatpush3.msra.mxu1 %v3903_v48 }
 0x7ae   : > { %4287 = vmatprep.subr.mxu1 %v4533_v1 }
 0x866   : > { %v2125_v31 = vpop.f32.mrf.mxu1 }
 0x867   : > { %v2126_v32 = vadd.f32 %v3891_v30, %v2125_v31 }
 0x868   : > { %v4242_v33 = vpop.f32.mrf.mxu1 }
 0x869   : > { %v2129_v34 = vadd.f32 %v2126_v32, %v1954_v21 }
 0x86b   : > { %v2132_v35 = vsel %vm672_vm2, %v2129_v34, 0.0 }
 0x86c   : > { %2133 = vadd.xlane.f32.xlu0 %v2132_v35 }
 0x8f5   : > { %v2134_v36 = vpop.xlane.xlu0 %2133 }
 0x8f6   : > { %v2135_v37 = vmul.f32 0.03125, %v2134_v36 }
 0x8f8   : > { %v2136_v38 = vsub.f32 %v2129_v34, %v2135_v37 }
 0x8fa   : > { %v2137_v39 = vmul.f32 %v2136_v38, %v2136_v38 }
 0x8fc   : > { %v2138_v40 = vsel %vm672_vm2, %v2137_v39, 0.0 }
 0x8fd   : > { %2139 = vadd.xlane.f32.xlu0 %v2138_v40 }
 0x986   : > { %v2140_v49 = vpop.xlane.xlu0 %2139 }
 0x987   : > { %v2141_v50 = vmul.f32 0.03125, %v2140_v49 }
 0x989   : > { %v2142_v51 = vadd.f32 1e-05, %v2141_v50 }
 0x98b   : > { %4449 = vrsqrt.f32 %v2142_v51 }
 0x998   : > { %v4450_v52 = vpop.eup %4449 }
 0x999   : > { %v2144_v54 = vmul.f32 %v4450_v52, %v2136_v38 }
 0x99b   : > { %v2151_v56 = vmul.f32 %v3893_v53, %v2144_v54 }
 0x99d   : > { %v5009_v57 = vadd.f32 %v3894_v55, %v2151_v56 }
 0x99f   : > { %4252 = vmatmul.mubr.msk.f32.vlgmr.msra.gmra.mxu0 %vm672_vm2, %v5009_v57  ;;  %4274 = vmatmul.mubr.msk.f32.vlgmr.msra.gmra.mxu1 %vm672_vm2, %v5009_v57 }
 0x9a0   : > { %4255 = vmatpush3.msra.mxu0 %v3902_v58  ;;  %4262 = vmatprep.mubr.msk.f32.mxu0 %vm4534_vm0, %v4533_v1 }
 0x9a1   : > { %4256 = vmatprep.subr.mxu0 %v4533_v1  ;;  %4289 = vmatprep.mubr.msk.f32.mxu1 %vm4534_vm0, %v4533_v1 }
 0x9a2   : > { %4257 = vmatpush3.msra.mxu0 %v3901_v59 }
 0x9a3   : > { %4258 = vmatprep.subr.mxu0 %v4533_v1 }
 0x9a4   : > { %4259 = vmatpush3.msra.mxu0 %v3900_v60 }
 0x9a5   : > { %4260 = vmatprep.subr.mxu0 %v4533_v1 }
 0x9a6   : > { %4261 = vmatpush3.msra.mxu0 %v3899_v61 }
 0x9a7   : > { %4263 = vmatmul.mubr.msk.f32.vlgmr.msra.gmra.mxu0 %vm672_vm2, %v5009_v57  ;;  %4276 = vmatprep.subr.mxu0 %v4533_v1 }
 0x9a8   : > { %4277 = vmatpush3.msra.mxu0 %v3910_v62  ;;  %4284 = vmatprep.mubr.msk.f32.mxu0 %vm4534_vm0, %v4533_v1 }
 0x9a9   : > { %4278 = vmatprep.subr.mxu0 %v4533_v1 }
 0x9aa   : > { %4279 = vmatpush3.msra.mxu0 %v3909_v63 }
 0x9ab   : > { %4280 = vmatprep.subr.mxu0 %v4533_v1 }
 0x9ac   : > { %4281 = vmatpush3.msra.mxu0 %v3908_v0 }
 0x9ad   : > { %4282 = vmatprep.subr.mxu0 %v4533_v1 }
 0x9ae   : > { %4283 = vmatpush3.msra.mxu0 %v3907_v2 }
 0x9af   : > { %4285 = vmatmul.mubr.msk.f32.vlgmr.msra.gmra.mxu0 %vm672_vm2, %v5009_v57  ;;  %4297 = vmatprep.subr.mxu0 %v4533_v1 }
 0x9b0   : > { %4299 = vmatprep.mubr.msk.f32.mxu0 %vm4534_vm0, %v4533_v1 }
 0xa5f   : > { %v2274_v4 = vpop.f32.mrf.mxu0  ;;  %v2414_v15 = vpop.f32.mrf.mxu1 }
 0xa60   : > { %v2275_v5 = vadd.f32 %v3915_v3, %v2274_v4  ;;  %v5066_v9 = vadd.f32 %v3917_v6, %v2414_v15 }
 0xa61   : > { %v4253_v7 = vpop.f32.mrf.mxu0  ;;  %v4275_v8 = vpop.f32.mrf.mxu1 }
 0xa62   : > { %2489 = vrot.lane.b32.xlu1 %v2275_v5, %s4535_s26  ;;  %v3935_v8 = vld [vmem:[%s5312_s5 + $0x20] sm:$0xff] }
 0xa66   : > { %2643 = vrot.lane.b32.xlu1 %v5066_v9, %s4535_s26 }
 0xa67   : > { %v2344_v11 = vpop.f32.mrf.mxu0 }
 0xa68   : > { %v5073_v12 = vadd.f32 %v3916_v10, %v2344_v11  ;;  %v3937_v10 = vld [vmem:[%s5312_s5 + $0x30] sm:$0xff] }
 0xa69   : > { %v4264_v13 = vpop.f32.mrf.mxu0 }
 0xa6a   : > { %2566 = vrot.lane.b32.xlu0 %v5073_v12, %s4535_s26 }
 0xa6f   : > { %v2484_v16 = vpop.f32.mrf.mxu0 }
 0xa70   : > { %v5080_v17 = vadd.f32 %v3918_v14, %v2484_v16  ;;  %v3938_v16 = vld [vmem:[%s5312_s5 + $0x38] sm:$0xff] }
 0xa71   : > { %v4286_v18 = vpop.f32.mrf.mxu0 }
 0xa72   : > { %2720 = vrot.lane.b32.xlu1 %v5080_v17, %s4535_s26  ;;  %s4475_s26 = sshll.u32 %s4537_s28, 4  ;;  %s4476_s26 = int_to_ptr.vmem [resolvable:$false] %s4475_s26 }
 0xa73   : > { %p4478_p0 = scmp.lt.s32.totalorder %s3801_s21, %s4476_s26 }
 0xad4   : > { %v2490_v19 = vpop.permute.xlu1 %2489 }
 0xad5   : > { %4288 = vmatpush3.xpose.msk.msra.mxu1 %vm959_vm3, %v2490_v19 }
 0xad6   : > { %4292 = vmatprep.subr.mxu1 %v4533_v1 }
 0xad8   : > { %4290 = vmatmul.mubr.msk.f32.vlgmr.msra.gmra.mxu1 %vm959_vm3, %v2275_v5  ;;  %v2644_v20 = vpop.permute.xlu1 %2643 }
 0xad9   : > { %4298 = vmatpush3.xpose.msk.msra.mxu0 %vm959_vm3, %v2644_v20  ;;  %4294 = vmatprep.mubr.msk.f32.mxu1 %vm4534_vm0, %v4533_v1 }
 0xada   : > { %4307 = vmatprep.subr.mxu0 %v4533_v1 }
 0xadc   : > { %v2567_v21 = vpop.permute.xlu0 %2566  ;;  %4300 = vmatmul.mubr.msk.f32.vlgmr.msra.gmra.mxu0 %vm959_vm3, %v5066_v9 }
 0xadd   : > { %4293 = vmatpush3.xpose.msk.msra.mxu1 %vm959_vm3, %v2567_v21  ;;  %4309 = vmatprep.mubr.msk.f32.mxu0 %vm4534_vm0, %v4533_v1 }
 0xade   : > { %4302 = vmatprep.subr.mxu1 %v4533_v1 }
 0xae0   : > { %4295 = vmatmul.mubr.msk.f32.vlgmr.msra.gmra.mxu1 %vm959_vm3, %v5073_v12 }
 0xae1   : > { %4304 = vmatprep.mubr.msk.f32.mxu1 %vm4534_vm0, %v4533_v1 }
 0xae4   : > { %v2721_v22 = vpop.permute.xlu1 %2720 }
 0xae5   : > { %4303 = vmatpush3.xpose.msk.msra.mxu1 %vm959_vm3, %v2721_v22 }
 0xae6   : > { %4312 = vmatprep.subr.mxu1 %v4533_v1 }
 0xae8   : > { %4305 = vmatmul.mubr.msk.f32.vlgmr.msra.gmra.mxu1 %vm959_vm3, %v5080_v17 }
 0xae9   : > { %4314 = vmatprep.mubr.msk.f32.mxu1 %vm4534_vm0, %v4533_v1 }
 0xb98   : > { %v2561_v23 = vpop.f32.mrf.mxu1 }
 0xb99   : > { %v2796_v24 = vsel %vm959_vm3, %v2561_v23, -inf }
 0xb9a   : > { %v4291_v25 = vpop.f32.mrf.mxu1  ;;  %2797 = vmax.xlane.f32.xlu0 %v2796_v24 }
 0xb9c   : > { %v2715_v26 = vpop.f32.mrf.mxu0 }
 0xb9d   : > { %v2802_v27 = vsel %vm959_vm3, %v2715_v26, -inf }
 0xb9e   : > { %2803 = vmax.xlane.f32.xlu0 %v2802_v27  ;;  %v4301_v28 = vpop.f32.mrf.mxu0 }
 0xba0   : > { %v2638_v29 = vpop.f32.mrf.mxu1 }
 0xba1   : > { %v2799_v30 = vsel %vm959_vm3, %v2638_v29, -inf }
 0xba2   : > { %v4296_v31 = vpop.f32.mrf.mxu1  ;;  %2800 = vmax.xlane.f32.xlu1 %v2799_v30 }
 0xba8   : > { %v2792_v32 = vpop.f32.mrf.mxu1 }
 0xba9   : > { %v2805_v33 = vsel %vm959_vm3, %v2792_v32, -inf }
 0xbaa   : > { %v4306_v34 = vpop.f32.mrf.mxu1  ;;  %2806 = vmax.xlane.f32.xlu0 %v2805_v33 }
 0xbab   : > { %v3944_v34 = vld [vmem:[%s5313_s6 + $0x1] ss:$0 sm:$0xff] }
 0xbb3   : > { %2840 = vrot.lane.b32.xlu1 %v2275_v5, %s4536_s0 }
 0xc23   : > { %v2798_v35 = vpop.xlane.xlu0 %2797 }
 0xc24   : > { %v2808_v36 = vsub.f32 %v2561_v23, %v2798_v35 }
 0xc26   : > { %v2812_v37 = vmul.f32 1.442695, %v2808_v36 }
 0xc27   : > { %v2804_v38 = vpop.xlane.xlu0 %2803 }
 0xc28   : > { %4451 = vpow2.f32 %v2812_v37  ;;  %v2810_v39 = vsub.f32 %v2715_v26, %v2804_v38 }
 0xc2a   : > { %v2816_v40 = vmul.f32 1.442695, %v2810_v39 }
 0xc2b   : > { %v2801_v41 = vpop.xlane.xlu1 %2800 }
 0xc2c   : > { %4453 = vpow2.f32 %v2816_v40  ;;  %v2809_v42 = vsub.f32 %v2638_v29, %v2801_v41 }
 0xc2e   : > { %v2814_v43 = vmul.f32 1.442695, %v2809_v42 }
 0xc2f   : > { %v2841_v44 = vpop.permute.xlu1 %2840 }
 0xc30   : > { %4455 = vpow2.f32 %v2814_v43  ;;  %4308 = vmatpush3.msra.mxu0 %v2841_v44 }
 0xc31   : > { %4317 = vmatprep.subr.mxu0 %v4533_v1 }
 0xc33   : > { %v2807_v45 = vpop.xlane.xlu0 %2806 }
 0xc34   : > { %v2811_v46 = vsub.f32 %v2792_v32, %v2807_v45  ;;  %v3952_v45 = vld [vmem:[%s5316_s9 + $0x38] sm:$0xff] }
 0xc35   : > { %v4452_v47 = vpop.eup %4451 }
 0xc36   : > { %v2818_v48 = vmul.f32 1.442695, %v2811_v46  ;;  %v2820_v49 = vsel %vm959_vm3, %v4452_v47, 0.0  ;;  %v3951_v46 = vld [vmem:[%s5316_s9 + $0x30] sm:$0xff] }
 0xc37   : > { %2821 = vadd.xlane.f32.xlu1 %v2820_v49  ;;  %v3962_v49 = vld [vmem:[%s5318_s11 + $0x70] sm:$0xff] }
 0xc38   : > { %4457 = vpow2.f32 %v2818_v48  ;;  %v3963_v48 = vld [vmem:[%s5318_s11 + $0x78] sm:$0xff] }
 0xc39   : > { %v4454_v50 = vpop.eup %4453 }
 0xc3a   : > { %v2826_v51 = vsel %vm959_vm3, %v4454_v50, 0.0 }
 0xc3b   : > { %2827 = vadd.xlane.f32.xlu1 %v2826_v51  ;;  %v3960_v51 = vld [vmem:[%s5318_s11 + $0x60] sm:$0xff] }
 0xc3d   : > { %v4456_v52 = vpop.eup %4455 }
 0xc3e   : > { %v2823_v53 = vsel %vm959_vm3, %v4456_v52, 0.0 }
 0xc3f   : > { %2824 = vadd.xlane.f32.xlu0 %v2823_v53 }
 0xc45   : > { %v4458_v54 = vpop.eup %4457 }
 0xc46   : > { %v2829_v55 = vsel %vm959_vm3, %v4458_v54, 0.0 }
 0xc47   : > { %2830 = vadd.xlane.f32.xlu0 %v2829_v55 }
 0xc4c   : > { %2992 = vrot.lane.b32.xlu1 %v5066_v9, %s4536_s0  ;;  %v3936_v9 = vld [vmem:[%s5312_s5 + $0x28] sm:$0xff] }
 0xc50   : > { %3068 = vrot.lane.b32.xlu1 %v5080_v17, %s4536_s0 }
 0xc5d   : > { %2916 = vrot.lane.b32.xlu0 %v5073_v12, %s4536_s0  ;;  %s4477_s0 = scalar_lea.vmem %s4476_s26, 32 }
 0xc5e   : > { %p4479_p1 = scmp.lt.s32.totalorder %s4477_s0, %s4471_s19 }
 0xc60   : > { %p4480_p2 = por %p4479_p1, %p4478_p0 }
 0xc62   : > { %p4481_p3 = pnand %p4480_p2, %p4474_p13 }
 0xcc0   : > { %v2822_v56 = vpop.xlane.xlu1 %2821 }
 0xcc1   : > { %4459 = vrcp.f32 %v2822_v56 }
 0xcc4   : > { %v2828_v58 = vpop.xlane.xlu1 %2827 }
 0xcc5   : > { %4461 = vrcp.f32 %v2828_v58  ;;  %v3947_v58 = vld [vmem:[%s5314_s7 + $0x1] ss:$0 sm:$0xff] }
 0xcc8   : > { %v2825_v59 = vpop.xlane.xlu0 %2824  ;;  %v2993_v63 = vpop.permute.xlu1 %2992 }
 0xcc9   : > { %4463 = vrcp.f32 %v2825_v59 }
 0xccc   : > { %v3069_v5 = vpop.permute.xlu1 %3068 }
 0xcce   : > { %v4460_v60 = vpop.eup %4459 }
 0xccf   : > { %v2836_v61 = vmul.f32 %v4460_v60, %v4452_v47  ;;  %v3949_v47 = vld [vmem:[%s5316_s9 + $0x20] sm:$0xff] }
 0xcd0   : > { %v2831_v62 = vpop.xlane.xlu0 %2830  ;;  %v3948_v60 = vld [vmem:[%s5315_s8 + $0x1] ss:$0 sm:$0xff] }
 0xcd1   : > { %4465 = vrcp.f32 %v2831_v62  ;;  %4310 = vmatmul.mubr.msk.f32.vlgmr.msra.gmra.mxu0 %vm959_vm3, %v2836_v61 }
 0xcd2   : > { %v4462_v0 = vpop.eup %4461  ;;  %4318 = vmatpush3.msra.mxu0 %v2993_v63  ;;  %4319 = vmatprep.mubr.msk.f32.mxu0 %vm4534_vm0, %v4533_v1  ;;  %v3958_v63 = vld [vmem:[%s5318_s11 + $0x50] sm:$0xff] }
 0xcd3   : > { %v2838_v2 = vmul.f32 %v4462_v0, %v4454_v50  ;;  %4327 = vmatprep.subr.mxu0 %v4533_v1  ;;  %v3961_v50 = vld [vmem:[%s5318_s11 + $0x68] sm:$0xff] }
 0xcd4   : > { %v2917_v3 = vpop.permute.xlu0 %2916  ;;  %v3957_v0 = vld [vmem:[%s5318_s11 + $0x48] sm:$0xff] }
 0xcd5   : > { %4313 = vmatpush3.msra.mxu1 %v2917_v3  ;;  %4320 = vmatmul.mubr.msk.f32.vlgmr.msra.gmra.mxu0 %vm959_vm3, %v2838_v2  ;;  %v3956_v2 = vld [vmem:[%s5318_s11 + $0x40] sm:$0xff] }
 0xcd6   : > { %v4464_v4 = vpop.eup %4463  ;;  %4322 = vmatprep.subr.mxu1 %v4533_v1  ;;  %4329 = vmatprep.mubr.msk.f32.mxu0 %vm4534_vm0, %v4533_v1  ;;  %v3954_v3 = vld [vmem:[%s5317_s10 + $0x1] ss:$0 sm:$0xff] }
 0xcd7   : > { %v2837_v15 = vmul.f32 %v4464_v4, %v4456_v52  ;;  %4328 = vmatpush3.msra.mxu0 %v3935_v8  ;;  %v3959_v52 = vld [vmem:[%s5318_s11 + $0x58] sm:$0xff] }
 0xcd8   : > { %4337 = vmatprep.subr.mxu0 %v4533_v1 }
 0xcd9   : > { %4315 = vmatmul.mubr.msk.f32.vlgmr.msra.gmra.mxu1 %vm959_vm3, %v2837_v15 }
 0xcda   : > { %4323 = vmatpush3.msra.mxu1 %v3069_v5  ;;  %4324 = vmatprep.mubr.msk.f32.mxu1 %vm4534_vm0, %v4533_v1 }
 0xcdb   : > { %4332 = vmatprep.subr.mxu1 %v4533_v1 }
 0xcde   : > { %v4466_v6 = vpop.eup %4465 }
 0xcdf   : > { %v2839_v7 = vmul.f32 %v4466_v6, %v4458_v54 }
 0xce1   : > { %4325 = vmatmul.mubr.msk.f32.vlgmr.msra.gmra.mxu1 %vm959_vm3, %v2839_v7  ;;  %v3965_v7 = vld [vmem:[%s5319_s12 + $0x1] ss:$0 sm:$0xff] }
 0xce2   : > { %4334 = vmatprep.mubr.msk.f32.mxu1 %vm4534_vm0, %v4533_v1  ;;  %4333 = vmatpush3.msra.mxu1 %v3936_v9 }
 0xce3   : > { %4342 = vmatprep.subr.mxu1 %v4533_v1 }
 0xd91   : > { %v2912_v11 = vpop.f32.mrf.mxu0 }
 0xd92   : > { %4330 = vmatmul.mubr.msk.f32.vlgmr.msra.gmra.mxu0 %vm959_vm3, %v2912_v11 }
 0xd93   : > { %v4311_v12 = vpop.f32.mrf.mxu0  ;;  %4338 = vmatpush3.msra.mxu0 %v3937_v10  ;;  %4339 = vmatprep.mubr.msk.f32.mxu0 %vm4534_vm0, %v4533_v1 }
 0xd94   : > { %4347 = vmatprep.subr.mxu0 %v4533_v1 }
 0xd95   : > { %v3064_v13 = vpop.f32.mrf.mxu0 }
 0xd96   : > { %4340 = vmatmul.mubr.msk.f32.vlgmr.msra.gmra.mxu0 %vm959_vm3, %v3064_v13 }
 0xd97   : > { %v4321_v14 = vpop.f32.mrf.mxu0  ;;  %4355 = vmatprep.mubr.msk.f32.mxu0 %vm4534_vm0, %v4533_v1  ;;  %4348 = vmatpush3.msra.mxu0 %v3952_v45 }
 0xd98   : > { %4349 = vmatprep.subr.mxu0 %v4533_v1 }
 0xd99   : > { %v2988_v17 = vpop.f32.mrf.mxu1  ;;  %4350 = vmatpush3.msra.mxu0 %v3951_v46 }
 0xd9a   : > { %4335 = vmatmul.mubr.msk.f32.vlgmr.msra.gmra.mxu1 %vm959_vm3, %v2988_v17  ;;  %4351 = vmatprep.subr.mxu0 %v4533_v1 }
 0xd9b   : > { %v4316_v18 = vpop.f32.mrf.mxu1  ;;  %4343 = vmatpush3.msra.mxu1 %v3938_v16  ;;  %4344 = vmatprep.mubr.msk.f32.mxu1 %vm4534_vm0, %v4533_v1 }
 0xd9c   : > { %4358 = vmatprep.subr.mxu1 %v4533_v1 }
 0xda1   : > { %v3140_v19 = vpop.f32.mrf.mxu1 }
 0xda2   : > { %4345 = vmatmul.mubr.msk.f32.vlgmr.msra.gmra.mxu1 %vm959_vm3, %v3140_v19  ;;  %v3710_v19 = vld [vmem:[%s5322_s15 + $0x18] sm:$0xff] }
 0xda3   : > { %v4326_v20 = vpop.f32.mrf.mxu1  ;;  %4374 = vmatprep.mubr.msk.f32.mxu1 %vm4534_vm0, %v4533_v1  ;;  %4359 = vmatpush3.msra.mxu1 %v3963_v48 }
 0xda4   : > { %4360 = vmatprep.subr.mxu1 %v4533_v1  ;;  %v3709_v20 = vld [vmem:[%s5322_s15 + $0x10] sm:$0xff] }
 0xda5   : > { %4361 = vmatpush3.msra.mxu1 %v3962_v49 }
 0xda6   : > { %4362 = vmatprep.subr.mxu1 %v4533_v1 }
 0xda7   : > { %4363 = vmatpush3.msra.mxu1 %v3961_v50 }
 0xda8   : > { %4364 = vmatprep.subr.mxu1 %v4533_v1 }
 0xda9   : > { %4365 = vmatpush3.msra.mxu1 %v3960_v51 }
 0xdaa   : > { %4366 = vmatprep.subr.mxu1 %v4533_v1 }
 0xdab   : > { %4367 = vmatpush3.msra.mxu1 %v3959_v52 }
 0xdac   : > { %4368 = vmatprep.subr.mxu1 %v4533_v1 }
 0xdad   : > { %4369 = vmatpush3.msra.mxu1 %v3958_v63 }
 0xdae   : > { %4370 = vmatprep.subr.mxu1 %v4533_v1 }
 0xdaf   : > { %4371 = vmatpush3.msra.mxu1 %v3957_v0 }
 0xdb0   : > { %4372 = vmatprep.subr.mxu1 %v4533_v1 }
 0xdb1   : > { %4373 = vmatpush3.msra.mxu1 %v3956_v2 }
 0xe52   : > { %v3218_v21 = vpop.f32.mrf.mxu0 }
 0xe53   : > { %v3441_v28 = vsel %vm672_vm2, %v3218_v21, 0.0  ;;  %v3708_v21 = vld [vmem:[%s5322_s15 + $0x8] sm:$0xff] }
 0xe54   : > { %v4331_v22 = vpop.f32.mrf.mxu0 }
 0xe55   : > { %v3707_v22 = vld [vmem:[%s5322_s15] sm:$0xff] }
 0xe56   : > { %v3364_v23 = vpop.f32.mrf.mxu0 }
 0xe57   : > { %v3444_v30 = vsel %vm672_vm2, %v3364_v23, 0.0 }
 0xe58   : > { %v4341_v24 = vpop.f32.mrf.mxu0 }
 0xe5a   : > { %v3291_v25 = vpop.f32.mrf.mxu1 }
 0xe5b   : > { %v3442_v26 = vsel %vm672_vm2, %v3291_v25, 0.0 }
 0xe5c   : > { %v4336_v27 = vpop.f32.mrf.mxu1  ;;  %v3443_v29 = vadd.f32 %v3442_v26, %v3441_v28 }
 0xe5d   : > { %v3969_v27 = vld [vmem:[%s5320_s13 + $0x1] ss:$0 sm:$0xff] }
 0xe5e   : > { %v3445_v32 = vadd.f32 %v3444_v30, %v3443_v29  ;;  %v3970_v29 = vld [vmem:[%s5321_s14 + $0x1] ss:$0 sm:$0xff] }
 0xe62   : > { %v3437_v31 = vpop.f32.mrf.mxu1 }
 0xe63   : > { %v3446_v33 = vsel %vm672_vm2, %v3437_v31, 0.0 }
 0xe64   : > { %v3447_v35 = vadd.f32 %v3446_v33, %v3445_v32  ;;  %v4346_v36 = vpop.f32.mrf.mxu1 }
 0xe66   : > { %v3456_v37 = vadd.f32 %v3944_v34, %v3447_v35 }
 0xe68   : > { %v3457_v38 = vadd.f32 %v3456_v37, %v5009_v57  ;;  %v3950_v57 = vld [vmem:[%s5316_s9 + $0x28] sm:$0xff] }
 0xe69   : > { %4352 = vmatpush3.msra.mxu0 %v3950_v57 }
 0xe6a   : > { %v3462_v39 = vsel %vm672_vm2, %v3457_v38, 0.0  ;;  %4353 = vmatprep.subr.mxu0 %v4533_v1 }
 0xe6b   : > { %3463 = vadd.xlane.f32.xlu0 %v3462_v39  ;;  %4354 = vmatpush3.msra.mxu0 %v3949_v47  ;;  %v3711_v39 = vld [vmem:[%s5323_s16] sm:$0x1] }
 0xe6c   : > { %4377 = vmatprep.subr.mxu0 %v4533_v1 }
 0xef4   : > { %v3464_v40 = vpop.xlane.xlu0 %3463 }
 0xef5   : > { %v3465_v41 = vmul.f32 0.03125, %v3464_v40 }
 0xef7   : > { %v3466_v42 = vsub.f32 %v3457_v38, %v3465_v41 }
 0xef9   : > { %v3467_v43 = vmul.f32 %v3466_v42, %v3466_v42 }
 0xefb   : > { %v3468_v44 = vsel %vm672_vm2, %v3467_v43, 0.0 }
 0xefc   : > { %3469 = vadd.xlane.f32.xlu1 %v3468_v44 }
 0xf85   : > { %v3470_v53 = vpop.xlane.xlu1 %3469 }
 0xf86   : > { %v3471_v54 = vmul.f32 0.03125, %v3470_v53 }
 0xf88   : > { %v3472_v55 = vadd.f32 1e-05, %v3471_v54 }
 0xf8a   : > { %4467 = vrsqrt.f32 %v3472_v55 }
 0xf97   : > { %v4468_v56 = vpop.eup %4467 }
 0xf98   : > { %v3474_v59 = vmul.f32 %v4468_v56, %v3466_v42 }
 0xf9a   : > { %v3481_v61 = vmul.f32 %v3947_v58, %v3474_v59 }
 0xf9c   : > { %v3488_v62 = vadd.f32 %v3948_v60, %v3481_v61 }
 0xf9e   : > { %4356 = vmatmul.mubr.msk.f32.vlgmr.msra.gmra.mxu0 %vm672_vm2, %v3488_v62 }
 0xf9f   : > { %4385 = vmatprep.mubr.msk.f32.mxu0 %vm4534_vm0, %v4533_v1  ;;  %4378 = vmatpush3.msra.mxu0 %v3710_v19 }
 0xfa0   : > { %4379 = vmatprep.subr.mxu0 %v4533_v1 }
 0xfa1   : > { %4380 = vmatpush3.msra.mxu0 %v3709_v20 }
 0xfa2   : > { %4381 = vmatprep.subr.mxu0 %v4533_v1 }
 0xfa3   : > { %4382 = vmatpush3.msra.mxu0 %v3708_v21 }
 0xfa4   : > { %4383 = vmatprep.subr.mxu0 %v4533_v1 }
 0xfa5   : > { %4384 = vmatpush3.msra.mxu0 %v3707_v22 }
0x105e   : > { %v3571_v4 = vpop.f32.mrf.mxu0 }
0x105f   : > { %v3572_v15 = vadd.f32 %v3954_v3, %v3571_v4 }
0x1060   : > { %v4357_v5 = vpop.f32.mrf.mxu0 }
0x1061   : > { %v3575_v6 = vmax.f32 %v3572_v15, 0.0 }
0x1063   : > { %4375 = vmatmul.mubr.msk.f32.vlgmr.msra.gmra.mxu1 %vm2055_vm4, %v3575_v6 }
0x1123   : > { %v3662_v8 = vpop.f32.mrf.mxu1 }
0x1124   : > { %v3663_v9 = vadd.f32 %v3965_v7, %v3662_v8 }
0x1125   : > { %v4376_v10 = vpop.f32.mrf.mxu1 }
0x1126   : > { %v3666_v11 = vadd.f32 %v3663_v9, %v3488_v62 }
0x1128   : > { %v3671_v12 = vsel %vm672_vm2, %v3666_v11, 0.0 }
0x1129   : > { %3672 = vadd.xlane.f32.xlu0 %v3671_v12 }
0x11b2   : > { %v3673_v13 = vpop.xlane.xlu0 %3672 }
0x11b3   : > { %v3674_v14 = vmul.f32 0.03125, %v3673_v13 }
0x11b5   : > { %v3675_v16 = vsub.f32 %v3666_v11, %v3674_v14 }
0x11b7   : > { %v3676_v17 = vmul.f32 %v3675_v16, %v3675_v16 }
0x11b9   : > { %v3677_v18 = vsel %vm672_vm2, %v3676_v17, 0.0 }
0x11ba   : > { %3678 = vadd.xlane.f32.xlu0 %v3677_v18 }
0x1243   : > { %v3679_v23 = vpop.xlane.xlu0 %3678 }
0x1244   : > { %v3680_v24 = vmul.f32 0.03125, %v3679_v23 }
0x1246   : > { %v3681_v25 = vadd.f32 1e-05, %v3680_v24 }
0x1248   : > { %4469 = vrsqrt.f32 %v3681_v25 }
0x1255   : > { %v4470_v26 = vpop.eup %4469 }
0x1256   : > { %v3683_v28 = vmul.f32 %v4470_v26, %v3675_v16 }
0x1258   : > { %v3690_v30 = vmul.f32 %v3969_v27, %v3683_v28 }
0x125a   : > { %v3697_v31 = vadd.f32 %v3970_v29, %v3690_v30 }
0x125c   : > { %v3698_v1 = vsel %vm672_vm2, %v3697_v31, 0.0 }
0x125d   : > { %v3699_v32 = vrot.slane %v3698_v1, 4 }
0x125f   : > { %v3700_v33 = vadd.f32 %v3699_v32, %v3698_v1 }
0x1261   : > { %v3701_v34 = vrot.slane %v3700_v33, 2 }
0x1263   : > { %v3702_v35 = vadd.f32 %v3701_v34, %v3700_v33 }
0x1265   : > { %v3703_v36 = vrot.slane %v3702_v35, 1 }
0x1267   : > { %v3704_v37 = vadd.f32 %v3703_v36, %v3702_v35 }
0x1269   : > { %v3706_v38 = vmul.f32 0.125, %v3704_v37 }
0x126b   : > { %4386 = vmatmul.mubr.msk.f32.vlgmr.msra.gmra.mxu0 %vm672_vm2, %v3706_v38 }
0x132b   : > { %v3781_v40 = vpop.f32.mrf.mxu0 }
0x132c   : > { %v3782_v41 = vadd.f32 %v3781_v40, %v3711_v39 }
0x132d   : > { %v4387_v42 = vpop.f32.mrf.mxu0 }
0x132e   : > { %3786 = vst.msk [vmem:[%s538_s29] sm:$0x1] %vm3785_vm5, %v3782_v41 }
0x132f   : > { %4484 = shalt.err (!%p4481_p3)
}
0x1330   : > { %s4485_s22 = scalar_lea.hbm %s5272_s24, 16  ;;  %s4489_s30 = scalar_lea.hbm %s5324_s17, 32 }
0x1331   : > { %p4486_p4 = scmp.ne.s32.totalorder %s5272_s24, %s4485_s22  ;;  %p4490_p9 = scmp.lt.s32.totalorder %s5272_s24, %s5324_s17 }
0x1332   : > { %p4491_p10 = scmp.lt.s32.totalorder %s4489_s30, %s4485_s22 }
0x1333   : > { %p4487_p7 = pnand %p4486_p4, %p4666_p5 }
0x1334   : > { %p4492_p11 = por %p4491_p10, %p4490_p9 }
0x1335   : > { %p4488_p8 = pneg %p4487_p7 }
0x1337   : > { %p4493_p12 = pnand %p4492_p11, %p4488_p8 }
0x1339   : > { %4496 = shalt.err (!%p4493_p12)
}
0x133a   : > { %4388 = dma.vmem_to_hbm [thread:$0]  (%p4666_p5), %s3801_s21, 16, %s5272_s24, %s3788_s27  }
0x133b PF: > { %s5346_s19 = sld [smem:[#allocation7_spill]] }
0x133c   : > { %s5347_s26 = sld [smem:[#allocation5_spill]] }
0x1341   : > { %p4394_p13 = scmp.ge.s32.totalorder %s5346_s19, 2 }
0x1342   : > { %s3812_s2 = sand.u32 1, %s5347_s26  }
0x1343   : > { %p4391_p0 = pnand %p4394_p13, %p4670_p6  ;;  %s3813_s18 = scalar_lea.sflag [#allocation3], %s3812_s2 }
0x1345   : > { %p4392_p1 = pneg %p4391_p0 }
0x1347   : > { %4514 = dma.done.wait (%p4392_p1), %s3813_s18, 16  }
0x1348   : > { %4516 = vsyncadd (%p4392_p1), %s3813_s18, 4294967280  ;;  %s5349_s27 = sld [smem:[#allocation8_spill]]  ;;  %s5352_s24 = smov %s4523_s25 }
0x1349   : > { %s5350_s22 = sld [smem:[#allocation6_spill]] }
0x134a   : > { %s5351_s26 = sld [smem:[#allocation9_spill]] }
0x134e   : > { %p27_p2 = scmp.ge.s32.totalorder %s5349_s27, 4  }
0x134f   : > { %s5353_s25 = smov %s5350_s22 }
0x1350   :  { %29 = sbr.rel (!%p27_p2) target bundleno = 7 (0x7), region = 135 }
0x1355   :  { %3817 = vsyncpa [#allocation3], 1 }
0x1356   :  { %3819 = vsyncpa [#allocation3 + $0x1], 1 }

</bundles_post_ra>
